<compile_context>
chip_gen: v5e
topology: v5e:2x2
jax: 0.10.0
libtpu: 0.0.40
codegen_flags: <defaults>
</compile_context>

<pallas_src>
import functools

import jax
import jax.numpy as jnp
from jax import lax
from jax.experimental import pallas as pl
from jax.experimental.pallas import tpu as pltpu


def _rup8(n):
    return ((n + 7) // 8) * 8


def _full_spec(shape):
    """Whole-array block (no grid), resident in VMEM."""
    zeros = (0,) * len(shape)
    return pl.BlockSpec(shape, lambda zeros=zeros: zeros)


# ----------------------------------------------------------------------------
# Packed-parameter layout: every weight lives in one (rows, 4H) f32 slab so the
# kernel gets a single input DMA.  All section offsets are multiples of 8 rows.
# ----------------------------------------------------------------------------
def _param_layout(num_layers, event_dim, seq_len, hidden_dim):
    H = hidden_dim
    lay = {}
    off = 0
    lay["l0_wih"] = off; off += _rup8(event_dim)     # (D, 4H), zero-padded rows
    lay["l0_whh"] = off; off += H                    # (H, 4H)
    lay["l0_b"] = off; off += 8                      # row 0: b_ih + b_hh
    for l in range(1, num_layers):
        lay[f"l{l}_wf"] = off; off += 2 * H          # [W_ih ; W_hh] fused, (2H, 4H)
        lay[f"l{l}_b"] = off; off += 8
    lay["out_w"] = off; off += seq_len * H           # (S*H, 4H), lanes >= out_dim zero
    lay["out_b"] = off; off += 8
    lay["rows"] = off
    return lay


def pack_params(params, event_dim, seq_len, hidden_dim):
    """Concatenate every weight into one (rows, 4H) f32 slab (single DMA)."""
    H = hidden_dim
    G = 4 * H

    def pad_rows(a, rows):
        return jnp.pad(a, ((0, rows - a.shape[0]), (0, 0)))

    def pad_lanes(a):
        return jnp.pad(a, ((0, 0), (0, G - a.shape[1])))

    l0 = params["lstm"][0]
    blocks = [
        pad_rows(l0["w_ih_t"], _rup8(event_dim)),
        l0["w_hh_t"],
        pad_rows(l0["bias"], 8),
    ]
    for lp in params["lstm"][1:]:
        blocks.append(jnp.concatenate([lp["w_ih_t"], lp["w_hh_t"]], axis=0))
        blocks.append(pad_rows(lp["bias"], 8))
    blocks.append(pad_lanes(params["out_w_t"]))
    blocks.append(pad_rows(pad_lanes(params["out_b"]), 8))
    packed = jnp.concatenate(blocks, axis=0).astype(jnp.float32)

    lay = _param_layout(len(params["lstm"]), event_dim, seq_len, hidden_dim)
    assert packed.shape == (lay["rows"], G), (packed.shape, lay["rows"], G)
    return packed


# ----------------------------------------------------------------------------
# Fused forward kernel: all LSTM layers (wavefront scheduled) + Flatten + Linear
# head in one call.  Gate order follows PyTorch: i, f, g, o.
# ----------------------------------------------------------------------------
def make_fused_kernel(num_layers, seq_len, hidden_dim, event_dim, out_dim, layout):
    H, S, D, G = hidden_dim, seq_len, event_dim, 4 * hidden_dim
    lay = layout
    last = num_layers - 1

    def cell(gates, c_prev):
        # Two full-vreg EUP passes over the whole (B, 4H) gate tile, then cheap
        # static lane slices of the activated quarters (PyTorch order i, f, g, o).
        sg = jax.nn.sigmoid(gates)
        tg = jnp.tanh(gates)
        i_g = sg[:, 0 * H:1 * H]
        f_g = sg[:, 1 * H:2 * H]
        o_g = sg[:, 3 * H:4 * H]
        g_g = tg[:, 2 * H:3 * H]
        c_new = f_g * c_prev + i_g * g_g
        h_new = o_g * jnp.tanh(c_new)
        return h_new, c_new

    def kernel(x_ref, p_ref, o_ref):
        B = x_ref.shape[0]
        x = x_ref[...]                                         # (B, S, D), tiny

        # -- parameters: static-offset slices of the packed slab, loaded once --
        w_ih0 = p_ref[pl.ds(lay["l0_wih"], D), :]              # (D, 4H)
        w_hh0 = p_ref[pl.ds(lay["l0_whh"], H), :]              # (H, 4H)
        b0 = p_ref[pl.ds(lay["l0_b"], 1), :]                   # (1, 4H)
        w_f = [None]
        b_l = [b0]
        for l in range(1, num_layers):
            w_f.append(p_ref[pl.ds(lay[f"l{l}_wf"], 2 * H), :])   # (2H, 4H)
            b_l.append(p_ref[pl.ds(lay[f"l{l}_b"], 1), :])        # (1, 4H)

        # -- layer-0 input projection, hoisted off the serial h->h chain --
        gx0 = [jnp.dot(x[:, t, :], w_ih0, preferred_element_type=jnp.float32) + b0
               for t in range(S)]                              # S x (B, 4H)

        h = [jnp.zeros((B, H), jnp.float32) for _ in range(num_layers)]
        c = [jnp.zeros((B, H), jnp.float32) for _ in range(num_layers)]

        # Head accumulator: Flatten + Linear folded into the recurrence as
        #   out = b_out + sum_t h_{L-1,t} @ W_out[t*H:(t+1)*H].
        # Lanes >= out_dim of the packed head weight/bias are zero, so we accumulate
        # at full 4H lane width (unmasked vreg ops) and slice once at the end.
        acc = jnp.zeros((B, G), jnp.float32) + p_ref[pl.ds(lay["out_b"], 1), :]

        # -- wavefront over diagonals d = t + l: cell (l, t) depends only on (l, t-1)
        #    and (l-1, t), both produced at diagonal d-1, so cells on one diagonal are
        #    independent and their MXU/EUP work can pipeline.  Descending l within a
        #    diagonal keeps h[l-1] holding h_{l-1, t} when (l, t) reads it. --
        for d in range(S + num_layers - 1):
            for l in range(num_layers - 1, -1, -1):
                t = d - l
                if t < 0 or t >= S:
                    continue
                if l == 0:
                    gates = gx0[t] + jnp.dot(
                        h[0], w_hh0, preferred_element_type=jnp.float32)
                else:
                    # Single fused matmul [h_{l-1,t} ; h_{l,t-1}] @ [W_ih ; W_hh], K=2H.
                    inp = jnp.concatenate([h[l - 1], h[l]], axis=1)     # (B, 2H)
                    gates = jnp.dot(
                        inp, w_f[l], preferred_element_type=jnp.float32) + b_l[l]
                h[l], c[l] = cell(gates, c[l])
                if l == last:
                    w_out_t = p_ref[pl.ds(lay["out_w"] + t * H, H), :]  # (H, 4H)
                    acc = acc + jnp.dot(
                        h[l], w_out_t, preferred_element_type=jnp.float32)

        o_ref[...] = acc[:, :out_dim]

    return kernel


def fire_predictor_forward(x, packed_params, *, num_layers, hidden_dim, out_dim):
    """x: (B, S, event_vec_dim), batch_first like the PyTorch module."""
    B, S, D = x.shape
    H = hidden_dim
    assert H % 8 == 0, "hidden_dim must be a multiple of 8 (f32 sublane count)"
    assert out_dim <= 4 * H, "head output must fit in the 4H-lane packed slab"
    layout = _param_layout(num_layers, D, S, H)
    assert packed_params.shape == (layout["rows"], 4 * H), packed_params.shape

    return pl.pallas_call(
        make_fused_kernel(num_layers, S, H, D, out_dim, layout),
        out_shape=jax.ShapeDtypeStruct((B, out_dim), jnp.float32),
        in_specs=[_full_spec((B, S, D)), _full_spec(packed_params.shape)],
        out_specs=_full_spec((B, out_dim)),
        compiler_params=pltpu.CompilerParams(
            vmem_limit_bytes=2 * 1024 * 1024),
    )(x.astype(jnp.float32), packed_params)


# ----------------------------------------------------------------------------
# Deterministic parameter initialization (matches PyTorch init distributions)
# ----------------------------------------------------------------------------
def init_params(key, event_vec_dim, seq_len, hidden_dim, num_layers):
    params = {"lstm": []}
    k_lstm = 1.0 / jnp.sqrt(jnp.float32(hidden_dim))
    keys = jax.random.split(key, num_layers * 4 + 2)
    ki = 0
    for layer in range(num_layers):
        d_in = event_vec_dim if layer == 0 else hidden_dim
        w_ih = jax.random.uniform(keys[ki], (4 * hidden_dim, d_in),
                                  minval=-k_lstm, maxval=k_lstm); ki += 1
        w_hh = jax.random.uniform(keys[ki], (4 * hidden_dim, hidden_dim),
                                  minval=-k_lstm, maxval=k_lstm); ki += 1
        b_ih = jax.random.uniform(keys[ki], (4 * hidden_dim,),
                                  minval=-k_lstm, maxval=k_lstm); ki += 1
        b_hh = jax.random.uniform(keys[ki], (4 * hidden_dim,),
                                  minval=-k_lstm, maxval=k_lstm); ki += 1
        params["lstm"].append({
            "w_ih_t": jnp.asarray(w_ih.T, jnp.float32),                 # (D_in, 4H)
            "w_hh_t": jnp.asarray(w_hh.T, jnp.float32),                 # (H, 4H)
            "bias": jnp.asarray((b_ih + b_hh)[None, :], jnp.float32),   # (1, 4H)
        })
    in_feat = hidden_dim * seq_len
    k_lin = 1.0 / jnp.sqrt(jnp.float32(in_feat))
    w_out = jax.random.uniform(keys[ki], (event_vec_dim, in_feat),
                               minval=-k_lin, maxval=k_lin); ki += 1
    b_out = jax.random.uniform(keys[ki], (event_vec_dim,),
                               minval=-k_lin, maxval=k_lin); ki += 1
    params["out_w_t"] = jnp.asarray(w_out.T, jnp.float32)               # (S*H, D)
    params["out_b"] = jnp.asarray(b_out[None, :], jnp.float32)          # (1, D)
    return params


# ----------------------------------------------------------------------------
# Pure-JAX reference (lax.scan LSTM) for correctness checking
# ----------------------------------------------------------------------------
def reference_forward(x, params):
    h_seq = jnp.transpose(x, (1, 0, 2)).astype(jnp.float32)
    B = x.shape[0]
    for lp in params["lstm"]:
        H = lp["w_hh_t"].shape[0]

        def step(carry, x_t, lp=lp, H=H):
            h, c = carry
            gates = x_t @ lp["w_ih_t"] + h @ lp["w_hh_t"] + lp["bias"][0]
            i = jax.nn.sigmoid(gates[:, :H])
            f = jax.nn.sigmoid(gates[:, H:2 * H])
            g = jnp.tanh(gates[:, 2 * H:3 * H])
            o = jax.nn.sigmoid(gates[:, 3 * H:])
            c = f * c + i * g
            h = o * jnp.tanh(c)
            return (h, c), h

        init = (jnp.zeros((B, H), jnp.float32), jnp.zeros((B, H), jnp.float32))
        _, h_seq = lax.scan(step, init, h_seq)
    flat = jnp.transpose(h_seq, (1, 0, 2)).reshape(B, -1)
    return flat @ params["out_w_t"] + params["out_b"][0]


if __name__ == "__main__":
    B, D, S, H, L = 2, 8, 8, 32, 2   # batch, event_vec_dim, seq_len, hidden_dim, num_layers

    key = jax.random.PRNGKey(0)
    kx, kp = jax.random.split(key)
    x = jax.random.normal(kx, (B, S, D), dtype=jnp.float32)
    params = init_params(kp, D, S, H, L)
    packed = pack_params(params, D, S, H)         # single weight slab, packed once

    fwd = jax.jit(functools.partial(
        fire_predictor_forward, num_layers=L, hidden_dim=H, out_dim=D))
    out = jax.block_until_ready(fwd(x, packed))

    ref = reference_forward(x, params)
    assert out.shape == (B, D), out.shape
    err = jnp.max(jnp.abs(out - ref))
    assert jnp.allclose(out, ref, atol=1e-4, rtol=1e-4), f"max abs diff {err}"

    print("KERNEL_OK")
</pallas_src>

<mosaic_0001>
module attributes {stable_mosaic.version = 11 : i64} {
  func.func @kernel(%arg0: memref<2x8x8xf32, #tpu.memory_space<vmem>>, %arg1: memref<384x128xf32, #tpu.memory_space<vmem>>, %arg2: memref<2x8xf32, #tpu.memory_space<vmem>>) attributes {dimension_semantics = [], scalar_prefetch = 0 : i64, scratch_operands = 0 : i64, tpu.core_type = #tpu.core_type<tc>} {
    %c0 = arith.constant 0 : index
    %c0_0 = arith.constant 0 : index
    %c0_1 = arith.constant 0 : index
    %0 = vector.load %arg0[%c0, %c0_0, %c0_1] : memref<2x8x8xf32, #tpu.memory_space<vmem>>, vector<2x8x8xf32>
    %c0_2 = arith.constant 0 : index
    %c0_3 = arith.constant 0 : index
    %1 = vector.load %arg1[%c0_2, %c0_3] : memref<384x128xf32, #tpu.memory_space<vmem>>, vector<8x128xf32>
    %c8 = arith.constant 8 : index
    %c0_4 = arith.constant 0 : index
    %2 = vector.load %arg1[%c8, %c0_4] : memref<384x128xf32, #tpu.memory_space<vmem>>, vector<32x128xf32>
    %c40 = arith.constant 40 : index
    %c0_5 = arith.constant 0 : index
    %3 = vector.load %arg1[%c40, %c0_5] : memref<384x128xf32, #tpu.memory_space<vmem>>, vector<1x128xf32>
    %c48 = arith.constant 48 : index
    %c0_6 = arith.constant 0 : index
    %4 = vector.load %arg1[%c48, %c0_6] : memref<384x128xf32, #tpu.memory_space<vmem>>, vector<64x128xf32>
    %c112 = arith.constant 112 : index
    %c0_7 = arith.constant 0 : index
    %5 = vector.load %arg1[%c112, %c0_7] : memref<384x128xf32, #tpu.memory_space<vmem>>, vector<1x128xf32>
    %6 = vector.extract_strided_slice %0 {offsets = [0, 0, 0], sizes = [2, 1, 8], strides = [1, 1, 1]} : vector<2x8x8xf32> to vector<2x1x8xf32>
    %7 = vector.shape_cast %6 : vector<2x1x8xf32> to vector<2x8xf32>
    %cst = arith.constant dense<0.000000e+00> : vector<2x128xf32>
    %8 = tpu.matmul %7, %1, %cst {dimension_numbers = #tpu.dot_dimension_numbers<[1], [0], [0], [1], [0, 0, 1, 1], [], []>} : vector<2x8xf32>, vector<8x128xf32>, vector<2x128xf32> -> vector<2x128xf32>
    %9 = vector.broadcast %3 : vector<1x128xf32> to vector<2x128xf32>
    %10 = arith.addf %8, %9 : vector<2x128xf32>
    %11 = vector.extract_strided_slice %0 {offsets = [0, 1, 0], sizes = [2, 1, 8], strides = [1, 1, 1]} : vector<2x8x8xf32> to vector<2x1x8xf32>
    %12 = vector.shape_cast %11 : vector<2x1x8xf32> to vector<2x8xf32>
    %cst_8 = arith.constant dense<0.000000e+00> : vector<2x128xf32>
    %13 = tpu.matmul %12, %1, %cst_8 {dimension_numbers = #tpu.dot_dimension_numbers<[1], [0], [0], [1], [0, 0, 1, 1], [], []>} : vector<2x8xf32>, vector<8x128xf32>, vector<2x128xf32> -> vector<2x128xf32>
    %14 = vector.broadcast %3 : vector<1x128xf32> to vector<2x128xf32>
    %15 = arith.addf %13, %14 : vector<2x128xf32>
    %16 = vector.extract_strided_slice %0 {offsets = [0, 2, 0], sizes = [2, 1, 8], strides = [1, 1, 1]} : vector<2x8x8xf32> to vector<2x1x8xf32>
    %17 = vector.shape_cast %16 : vector<2x1x8xf32> to vector<2x8xf32>
    %cst_9 = arith.constant dense<0.000000e+00> : vector<2x128xf32>
    %18 = tpu.matmul %17, %1, %cst_9 {dimension_numbers = #tpu.dot_dimension_numbers<[1], [0], [0], [1], [0, 0, 1, 1], [], []>} : vector<2x8xf32>, vector<8x128xf32>, vector<2x128xf32> -> vector<2x128xf32>
    %19 = vector.broadcast %3 : vector<1x128xf32> to vector<2x128xf32>
    %20 = arith.addf %18, %19 : vector<2x128xf32>
    %21 = vector.extract_strided_slice %0 {offsets = [0, 3, 0], sizes = [2, 1, 8], strides = [1, 1, 1]} : vector<2x8x8xf32> to vector<2x1x8xf32>
    %22 = vector.shape_cast %21 : vector<2x1x8xf32> to vector<2x8xf32>
    %cst_10 = arith.constant dense<0.000000e+00> : vector<2x128xf32>
    %23 = tpu.matmul %22, %1, %cst_10 {dimension_numbers = #tpu.dot_dimension_numbers<[1], [0], [0], [1], [0, 0, 1, 1], [], []>} : vector<2x8xf32>, vector<8x128xf32>, vector<2x128xf32> -> vector<2x128xf32>
    %24 = vector.broadcast %3 : vector<1x128xf32> to vector<2x128xf32>
    %25 = arith.addf %23, %24 : vector<2x128xf32>
    %26 = vector.extract_strided_slice %0 {offsets = [0, 4, 0], sizes = [2, 1, 8], strides = [1, 1, 1]} : vector<2x8x8xf32> to vector<2x1x8xf32>
    %27 = vector.shape_cast %26 : vector<2x1x8xf32> to vector<2x8xf32>
    %cst_11 = arith.constant dense<0.000000e+00> : vector<2x128xf32>
    %28 = tpu.matmul %27, %1, %cst_11 {dimension_numbers = #tpu.dot_dimension_numbers<[1], [0], [0], [1], [0, 0, 1, 1], [], []>} : vector<2x8xf32>, vector<8x128xf32>, vector<2x128xf32> -> vector<2x128xf32>
    %29 = vector.broadcast %3 : vector<1x128xf32> to vector<2x128xf32>
    %30 = arith.addf %28, %29 : vector<2x128xf32>
    %31 = vector.extract_strided_slice %0 {offsets = [0, 5, 0], sizes = [2, 1, 8], strides = [1, 1, 1]} : vector<2x8x8xf32> to vector<2x1x8xf32>
    %32 = vector.shape_cast %31 : vector<2x1x8xf32> to vector<2x8xf32>
    %cst_12 = arith.constant dense<0.000000e+00> : vector<2x128xf32>
    %33 = tpu.matmul %32, %1, %cst_12 {dimension_numbers = #tpu.dot_dimension_numbers<[1], [0], [0], [1], [0, 0, 1, 1], [], []>} : vector<2x8xf32>, vector<8x128xf32>, vector<2x128xf32> -> vector<2x128xf32>
    %34 = vector.broadcast %3 : vector<1x128xf32> to vector<2x128xf32>
    %35 = arith.addf %33, %34 : vector<2x128xf32>
    %36 = vector.extract_strided_slice %0 {offsets = [0, 6, 0], sizes = [2, 1, 8], strides = [1, 1, 1]} : vector<2x8x8xf32> to vector<2x1x8xf32>
    %37 = vector.shape_cast %36 : vector<2x1x8xf32> to vector<2x8xf32>
    %cst_13 = arith.constant dense<0.000000e+00> : vector<2x128xf32>
    %38 = tpu.matmul %37, %1, %cst_13 {dimension_numbers = #tpu.dot_dimension_numbers<[1], [0], [0], [1], [0, 0, 1, 1], [], []>} : vector<2x8xf32>, vector<8x128xf32>, vector<2x128xf32> -> vector<2x128xf32>
    %39 = vector.broadcast %3 : vector<1x128xf32> to vector<2x128xf32>
    %40 = arith.addf %38, %39 : vector<2x128xf32>
    %41 = vector.extract_strided_slice %0 {offsets = [0, 7, 0], sizes = [2, 1, 8], strides = [1, 1, 1]} : vector<2x8x8xf32> to vector<2x1x8xf32>
    %42 = vector.shape_cast %41 : vector<2x1x8xf32> to vector<2x8xf32>
    %cst_14 = arith.constant dense<0.000000e+00> : vector<2x128xf32>
    %43 = tpu.matmul %42, %1, %cst_14 {dimension_numbers = #tpu.dot_dimension_numbers<[1], [0], [0], [1], [0, 0, 1, 1], [], []>} : vector<2x8xf32>, vector<8x128xf32>, vector<2x128xf32> -> vector<2x128xf32>
    %44 = vector.broadcast %3 : vector<1x128xf32> to vector<2x128xf32>
    %45 = arith.addf %43, %44 : vector<2x128xf32>
    %cst_15 = arith.constant 0.000000e+00 : f32
    %46 = vector.broadcast %cst_15 : f32 to vector<2x32xf32>
    %cst_16 = arith.constant 0.000000e+00 : f32
    %47 = vector.broadcast %cst_16 : f32 to vector<2x32xf32>
    %cst_17 = arith.constant 0.000000e+00 : f32
    %48 = vector.broadcast %cst_17 : f32 to vector<2x32xf32>
    %cst_18 = arith.constant 0.000000e+00 : f32
    %49 = vector.broadcast %cst_18 : f32 to vector<2x32xf32>
    %cst_19 = arith.constant 0.000000e+00 : f32
    %50 = vector.broadcast %cst_19 : f32 to vector<2x128xf32>
    %c376 = arith.constant 376 : index
    %c0_20 = arith.constant 0 : index
    %51 = vector.load %arg1[%c376, %c0_20] : memref<384x128xf32, #tpu.memory_space<vmem>>, vector<1x128xf32>
    %52 = vector.broadcast %51 : vector<1x128xf32> to vector<2x128xf32>
    %53 = arith.addf %50, %52 : vector<2x128xf32>
    %cst_21 = arith.constant dense<0.000000e+00> : vector<2x128xf32>
    %54 = tpu.matmul %46, %2, %cst_21 {dimension_numbers = #tpu.dot_dimension_numbers<[1], [0], [0], [1], [0, 0, 1, 1], [], []>} : vector<2x32xf32>, vector<32x128xf32>, vector<2x128xf32> -> vector<2x128xf32>
    %55 = arith.addf %10, %54 : vector<2x128xf32>
    %56 = arith.negf %55 : vector<2x128xf32>
    %57 = math.exp %56 : vector<2x128xf32>
    %cst_22 = arith.constant 1.000000e+00 : f32
    %58 = vector.broadcast %cst_22 : f32 to vector<2x128xf32>
    %59 = arith.addf %58, %57 : vector<2x128xf32>
    %60 = arith.divf %58, %59 : vector<2x128xf32>
    %61 = math.tanh %55 : vector<2x128xf32>
    %62 = vector.extract_strided_slice %60 {offsets = [0, 0], sizes = [2, 32], strides = [1, 1]} : vector<2x128xf32> to vector<2x32xf32>
    %63 = vector.extract_strided_slice %60 {offsets = [0, 32], sizes = [2, 32], strides = [1, 1]} : vector<2x128xf32> to vector<2x32xf32>
    %64 = vector.extract_strided_slice %60 {offsets = [0, 96], sizes = [2, 32], strides = [1, 1]} : vector<2x128xf32> to vector<2x32xf32>
    %65 = vector.extract_strided_slice %61 {offsets = [0, 64], sizes = [2, 32], strides = [1, 1]} : vector<2x128xf32> to vector<2x32xf32>
    %66 = arith.mulf %63, %48 : vector<2x32xf32>
    %67 = arith.mulf %62, %65 : vector<2x32xf32>
    %68 = arith.addf %66, %67 : vector<2x32xf32>
    %69 = math.tanh %68 : vector<2x32xf32>
    %70 = arith.mulf %64, %69 : vector<2x32xf32>
    %71 = tpu.concatenate %70, %47 in 1 : vector<2x32xf32>, vector<2x32xf32> -> vector<2x64xf32>
    %cst_23 = arith.constant dense<0.000000e+00> : vector<2x128xf32>
    %72 = tpu.matmul %71, %4, %cst_23 {dimension_numbers = #tpu.dot_dimension_numbers<[1], [0], [0], [1], [0, 0, 1, 1], [], []>} : vector<2x64xf32>, vector<64x128xf32>, vector<2x128xf32> -> vector<2x128xf32>
    %73 = vector.broadcast %5 : vector<1x128xf32> to vector<2x128xf32>
    %74 = arith.addf %72, %73 : vector<2x128xf32>
    %75 = arith.negf %74 : vector<2x128xf32>
    %76 = math.exp %75 : vector<2x128xf32>
    %cst_24 = arith.constant 1.000000e+00 : f32
    %77 = vector.broadcast %cst_24 : f32 to vector<2x128xf32>
    %78 = arith.addf %77, %76 : vector<2x128xf32>
    %79 = arith.divf %77, %78 : vector<2x128xf32>
    %80 = math.tanh %74 : vector<2x128xf32>
    %81 = vector.extract_strided_slice %79 {offsets = [0, 0], sizes = [2, 32], strides = [1, 1]} : vector<2x128xf32> to vector<2x32xf32>
    %82 = vector.extract_strided_slice %79 {offsets = [0, 32], sizes = [2, 32], strides = [1, 1]} : vector<2x128xf32> to vector<2x32xf32>
    %83 = vector.extract_strided_slice %79 {offsets = [0, 96], sizes = [2, 32], strides = [1, 1]} : vector<2x128xf32> to vector<2x32xf32>
    %84 = vector.extract_strided_slice %80 {offsets = [0, 64], sizes = [2, 32], strides = [1, 1]} : vector<2x128xf32> to vector<2x32xf32>
    %85 = arith.mulf %82, %49 : vector<2x32xf32>
    %86 = arith.mulf %81, %84 : vector<2x32xf32>
    %87 = arith.addf %85, %86 : vector<2x32xf32>
    %88 = math.tanh %87 : vector<2x32xf32>
    %89 = arith.mulf %83, %88 : vector<2x32xf32>
    %c120 = arith.constant 120 : index
    %c0_25 = arith.constant 0 : index
    %90 = vector.load %arg1[%c120, %c0_25] : memref<384x128xf32, #tpu.memory_space<vmem>>, vector<32x128xf32>
    %cst_26 = arith.constant dense<0.000000e+00> : vector<2x128xf32>
    %91 = tpu.matmul %89, %90, %cst_26 {dimension_numbers = #tpu.dot_dimension_numbers<[1], [0], [0], [1], [0, 0, 1, 1], [], []>} : vector<2x32xf32>, vector<32x128xf32>, vector<2x128xf32> -> vector<2x128xf32>
    %92 = arith.addf %53, %91 : vector<2x128xf32>
    %cst_27 = arith.constant dense<0.000000e+00> : vector<2x128xf32>
    %93 = tpu.matmul %70, %2, %cst_27 {dimension_numbers = #tpu.dot_dimension_numbers<[1], [0], [0], [1], [0, 0, 1, 1], [], []>} : vector<2x32xf32>, vector<32x128xf32>, vector<2x128xf32> -> vector<2x128xf32>
    %94 = arith.addf %15, %93 : vector<2x128xf32>
    %95 = arith.negf %94 : vector<2x128xf32>
    %96 = math.exp %95 : vector<2x128xf32>
    %cst_28 = arith.constant 1.000000e+00 : f32
    %97 = vector.broadcast %cst_28 : f32 to vector<2x128xf32>
    %98 = arith.addf %97, %96 : vector<2x128xf32>
    %99 = arith.divf %97, %98 : vector<2x128xf32>
    %100 = math.tanh %94 : vector<2x128xf32>
    %101 = vector.extract_strided_slice %99 {offsets = [0, 0], sizes = [2, 32], strides = [1, 1]} : vector<2x128xf32> to vector<2x32xf32>
    %102 = vector.extract_strided_slice %99 {offsets = [0, 32], sizes = [2, 32], strides = [1, 1]} : vector<2x128xf32> to vector<2x32xf32>
    %103 = vector.extract_strided_slice %99 {offsets = [0, 96], sizes = [2, 32], strides = [1, 1]} : vector<2x128xf32> to vector<2x32xf32>
    %104 = vector.extract_strided_slice %100 {offsets = [0, 64], sizes = [2, 32], strides = [1, 1]} : vector<2x128xf32> to vector<2x32xf32>
    %105 = arith.mulf %102, %68 : vector<2x32xf32>
    %106 = arith.mulf %101, %104 : vector<2x32xf32>
    %107 = arith.addf %105, %106 : vector<2x32xf32>
    %108 = math.tanh %107 : vector<2x32xf32>
    %109 = arith.mulf %103, %108 : vector<2x32xf32>
    %110 = tpu.concatenate %109, %89 in 1 : vector<2x32xf32>, vector<2x32xf32> -> vector<2x64xf32>
    %cst_29 = arith.constant dense<0.000000e+00> : vector<2x128xf32>
    %111 = tpu.matmul %110, %4, %cst_29 {dimension_numbers = #tpu.dot_dimension_numbers<[1], [0], [0], [1], [0, 0, 1, 1], [], []>} : vector<2x64xf32>, vector<64x128xf32>, vector<2x128xf32> -> vector<2x128xf32>
    %112 = vector.broadcast %5 : vector<1x128xf32> to vector<2x128xf32>
    %113 = arith.addf %111, %112 : vector<2x128xf32>
    %114 = arith.negf %113 : vector<2x128xf32>
    %115 = math.exp %114 : vector<2x128xf32>
    %cst_30 = arith.constant 1.000000e+00 : f32
    %116 = vector.broadcast %cst_30 : f32 to vector<2x128xf32>
    %117 = arith.addf %116, %115 : vector<2x128xf32>
    %118 = arith.divf %116, %117 : vector<2x128xf32>
    %119 = math.tanh %113 : vector<2x128xf32>
    %120 = vector.extract_strided_slice %118 {offsets = [0, 0], sizes = [2, 32], strides = [1, 1]} : vector<2x128xf32> to vector<2x32xf32>
    %121 = vector.extract_strided_slice %118 {offsets = [0, 32], sizes = [2, 32], strides = [1, 1]} : vector<2x128xf32> to vector<2x32xf32>
    %122 = vector.extract_strided_slice %118 {offsets = [0, 96], sizes = [2, 32], strides = [1, 1]} : vector<2x128xf32> to vector<2x32xf32>
    %123 = vector.extract_strided_slice %119 {offsets = [0, 64], sizes = [2, 32], strides = [1, 1]} : vector<2x128xf32> to vector<2x32xf32>
    %124 = arith.mulf %121, %87 : vector<2x32xf32>
    %125 = arith.mulf %120, %123 : vector<2x32xf32>
    %126 = arith.addf %124, %125 : vector<2x32xf32>
    %127 = math.tanh %126 : vector<2x32xf32>
    %128 = arith.mulf %122, %127 : vector<2x32xf32>
    %c152 = arith.constant 152 : index
    %c0_31 = arith.constant 0 : index
    %129 = vector.load %arg1[%c152, %c0_31] : memref<384x128xf32, #tpu.memory_space<vmem>>, vector<32x128xf32>
    %cst_32 = arith.constant dense<0.000000e+00> : vector<2x128xf32>
    %130 = tpu.matmul %128, %129, %cst_32 {dimension_numbers = #tpu.dot_dimension_numbers<[1], [0], [0], [1], [0, 0, 1, 1], [], []>} : vector<2x32xf32>, vector<32x128xf32>, vector<2x128xf32> -> vector<2x128xf32>
    %131 = arith.addf %92, %130 : vector<2x128xf32>
    %cst_33 = arith.constant dense<0.000000e+00> : vector<2x128xf32>
    %132 = tpu.matmul %109, %2, %cst_33 {dimension_numbers = #tpu.dot_dimension_numbers<[1], [0], [0], [1], [0, 0, 1, 1], [], []>} : vector<2x32xf32>, vector<32x128xf32>, vector<2x128xf32> -> vector<2x128xf32>
    %133 = arith.addf %20, %132 : vector<2x128xf32>
    %134 = arith.negf %133 : vector<2x128xf32>
    %135 = math.exp %134 : vector<2x128xf32>
    %cst_34 = arith.constant 1.000000e+00 : f32
    %136 = vector.broadcast %cst_34 : f32 to vector<2x128xf32>
    %137 = arith.addf %136, %135 : vector<2x128xf32>
    %138 = arith.divf %136, %137 : vector<2x128xf32>
    %139 = math.tanh %133 : vector<2x128xf32>
    %140 = vector.extract_strided_slice %138 {offsets = [0, 0], sizes = [2, 32], strides = [1, 1]} : vector<2x128xf32> to vector<2x32xf32>
    %141 = vector.extract_strided_slice %138 {offsets = [0, 32], sizes = [2, 32], strides = [1, 1]} : vector<2x128xf32> to vector<2x32xf32>
    %142 = vector.extract_strided_slice %138 {offsets = [0, 96], sizes = [2, 32], strides = [1, 1]} : vector<2x128xf32> to vector<2x32xf32>
    %143 = vector.extract_strided_slice %139 {offsets = [0, 64], sizes = [2, 32], strides = [1, 1]} : vector<2x128xf32> to vector<2x32xf32>
    %144 = arith.mulf %141, %107 : vector<2x32xf32>
    %145 = arith.mulf %140, %143 : vector<2x32xf32>
    %146 = arith.addf %144, %145 : vector<2x32xf32>
    %147 = math.tanh %146 : vector<2x32xf32>
    %148 = arith.mulf %142, %147 : vector<2x32xf32>
    %149 = tpu.concatenate %148, %128 in 1 : vector<2x32xf32>, vector<2x32xf32> -> vector<2x64xf32>
    %cst_35 = arith.constant dense<0.000000e+00> : vector<2x128xf32>
    %150 = tpu.matmul %149, %4, %cst_35 {dimension_numbers = #tpu.dot_dimension_numbers<[1], [0], [0], [1], [0, 0, 1, 1], [], []>} : vector<2x64xf32>, vector<64x128xf32>, vector<2x128xf32> -> vector<2x128xf32>
    %151 = vector.broadcast %5 : vector<1x128xf32> to vector<2x128xf32>
    %152 = arith.addf %150, %151 : vector<2x128xf32>
    %153 = arith.negf %152 : vector<2x128xf32>
    %154 = math.exp %153 : vector<2x128xf32>
    %cst_36 = arith.constant 1.000000e+00 : f32
    %155 = vector.broadcast %cst_36 : f32 to vector<2x128xf32>
    %156 = arith.addf %155, %154 : vector<2x128xf32>
    %157 = arith.divf %155, %156 : vector<2x128xf32>
    %158 = math.tanh %152 : vector<2x128xf32>
    %159 = vector.extract_strided_slice %157 {offsets = [0, 0], sizes = [2, 32], strides = [1, 1]} : vector<2x128xf32> to vector<2x32xf32>
    %160 = vector.extract_strided_slice %157 {offsets = [0, 32], sizes = [2, 32], strides = [1, 1]} : vector<2x128xf32> to vector<2x32xf32>
    %161 = vector.extract_strided_slice %157 {offsets = [0, 96], sizes = [2, 32], strides = [1, 1]} : vector<2x128xf32> to vector<2x32xf32>
    %162 = vector.extract_strided_slice %158 {offsets = [0, 64], sizes = [2, 32], strides = [1, 1]} : vector<2x128xf32> to vector<2x32xf32>
    %163 = arith.mulf %160, %126 : vector<2x32xf32>
    %164 = arith.mulf %159, %162 : vector<2x32xf32>
    %165 = arith.addf %163, %164 : vector<2x32xf32>
    %166 = math.tanh %165 : vector<2x32xf32>
    %167 = arith.mulf %161, %166 : vector<2x32xf32>
    %c184 = arith.constant 184 : index
    %c0_37 = arith.constant 0 : index
    %168 = vector.load %arg1[%c184, %c0_37] : memref<384x128xf32, #tpu.memory_space<vmem>>, vector<32x128xf32>
    %cst_38 = arith.constant dense<0.000000e+00> : vector<2x128xf32>
    %169 = tpu.matmul %167, %168, %cst_38 {dimension_numbers = #tpu.dot_dimension_numbers<[1], [0], [0], [1], [0, 0, 1, 1], [], []>} : vector<2x32xf32>, vector<32x128xf32>, vector<2x128xf32> -> vector<2x128xf32>
    %170 = arith.addf %131, %169 : vector<2x128xf32>
    %cst_39 = arith.constant dense<0.000000e+00> : vector<2x128xf32>
    %171 = tpu.matmul %148, %2, %cst_39 {dimension_numbers = #tpu.dot_dimension_numbers<[1], [0], [0], [1], [0, 0, 1, 1], [], []>} : vector<2x32xf32>, vector<32x128xf32>, vector<2x128xf32> -> vector<2x128xf32>
    %172 = arith.addf %25, %171 : vector<2x128xf32>
    %173 = arith.negf %172 : vector<2x128xf32>
    %174 = math.exp %173 : vector<2x128xf32>
    %cst_40 = arith.constant 1.000000e+00 : f32
    %175 = vector.broadcast %cst_40 : f32 to vector<2x128xf32>
    %176 = arith.addf %175, %174 : vector<2x128xf32>
    %177 = arith.divf %175, %176 : vector<2x128xf32>
    %178 = math.tanh %172 : vector<2x128xf32>
    %179 = vector.extract_strided_slice %177 {offsets = [0, 0], sizes = [2, 32], strides = [1, 1]} : vector<2x128xf32> to vector<2x32xf32>
    %180 = vector.extract_strided_slice %177 {offsets = [0, 32], sizes = [2, 32], strides = [1, 1]} : vector<2x128xf32> to vector<2x32xf32>
    %181 = vector.extract_strided_slice %177 {offsets = [0, 96], sizes = [2, 32], strides = [1, 1]} : vector<2x128xf32> to vector<2x32xf32>
    %182 = vector.extract_strided_slice %178 {offsets = [0, 64], sizes = [2, 32], strides = [1, 1]} : vector<2x128xf32> to vector<2x32xf32>
    %183 = arith.mulf %180, %146 : vector<2x32xf32>
    %184 = arith.mulf %179, %182 : vector<2x32xf32>
    %185 = arith.addf %183, %184 : vector<2x32xf32>
    %186 = math.tanh %185 : vector<2x32xf32>
    %187 = arith.mulf %181, %186 : vector<2x32xf32>
    %188 = tpu.concatenate %187, %167 in 1 : vector<2x32xf32>, vector<2x32xf32> -> vector<2x64xf32>
    %cst_41 = arith.constant dense<0.000000e+00> : vector<2x128xf32>
    %189 = tpu.matmul %188, %4, %cst_41 {dimension_numbers = #tpu.dot_dimension_numbers<[1], [0], [0], [1], [0, 0, 1, 1], [], []>} : vector<2x64xf32>, vector<64x128xf32>, vector<2x128xf32> -> vector<2x128xf32>
    %190 = vector.broadcast %5 : vector<1x128xf32> to vector<2x128xf32>
    %191 = arith.addf %189, %190 : vector<2x128xf32>
    %192 = arith.negf %191 : vector<2x128xf32>
    %193 = math.exp %192 : vector<2x128xf32>
    %cst_42 = arith.constant 1.000000e+00 : f32
    %194 = vector.broadcast %cst_42 : f32 to vector<2x128xf32>
    %195 = arith.addf %194, %193 : vector<2x128xf32>
    %196 = arith.divf %194, %195 : vector<2x128xf32>
    %197 = math.tanh %191 : vector<2x128xf32>
    %198 = vector.extract_strided_slice %196 {offsets = [0, 0], sizes = [2, 32], strides = [1, 1]} : vector<2x128xf32> to vector<2x32xf32>
    %199 = vector.extract_strided_slice %196 {offsets = [0, 32], sizes = [2, 32], strides = [1, 1]} : vector<2x128xf32> to vector<2x32xf32>
    %200 = vector.extract_strided_slice %196 {offsets = [0, 96], sizes = [2, 32], strides = [1, 1]} : vector<2x128xf32> to vector<2x32xf32>
    %201 = vector.extract_strided_slice %197 {offsets = [0, 64], sizes = [2, 32], strides = [1, 1]} : vector<2x128xf32> to vector<2x32xf32>
    %202 = arith.mulf %199, %165 : vector<2x32xf32>
    %203 = arith.mulf %198, %201 : vector<2x32xf32>
    %204 = arith.addf %202, %203 : vector<2x32xf32>
    %205 = math.tanh %204 : vector<2x32xf32>
    %206 = arith.mulf %200, %205 : vector<2x32xf32>
    %c216 = arith.constant 216 : index
    %c0_43 = arith.constant 0 : index
    %207 = vector.load %arg1[%c216, %c0_43] : memref<384x128xf32, #tpu.memory_space<vmem>>, vector<32x128xf32>
    %cst_44 = arith.constant dense<0.000000e+00> : vector<2x128xf32>
    %208 = tpu.matmul %206, %207, %cst_44 {dimension_numbers = #tpu.dot_dimension_numbers<[1], [0], [0], [1], [0, 0, 1, 1], [], []>} : vector<2x32xf32>, vector<32x128xf32>, vector<2x128xf32> -> vector<2x128xf32>
    %209 = arith.addf %170, %208 : vector<2x128xf32>
    %cst_45 = arith.constant dense<0.000000e+00> : vector<2x128xf32>
    %210 = tpu.matmul %187, %2, %cst_45 {dimension_numbers = #tpu.dot_dimension_numbers<[1], [0], [0], [1], [0, 0, 1, 1], [], []>} : vector<2x32xf32>, vector<32x128xf32>, vector<2x128xf32> -> vector<2x128xf32>
    %211 = arith.addf %30, %210 : vector<2x128xf32>
    %212 = arith.negf %211 : vector<2x128xf32>
    %213 = math.exp %212 : vector<2x128xf32>
    %cst_46 = arith.constant 1.000000e+00 : f32
    %214 = vector.broadcast %cst_46 : f32 to vector<2x128xf32>
    %215 = arith.addf %214, %213 : vector<2x128xf32>
    %216 = arith.divf %214, %215 : vector<2x128xf32>
    %217 = math.tanh %211 : vector<2x128xf32>
    %218 = vector.extract_strided_slice %216 {offsets = [0, 0], sizes = [2, 32], strides = [1, 1]} : vector<2x128xf32> to vector<2x32xf32>
    %219 = vector.extract_strided_slice %216 {offsets = [0, 32], sizes = [2, 32], strides = [1, 1]} : vector<2x128xf32> to vector<2x32xf32>
    %220 = vector.extract_strided_slice %216 {offsets = [0, 96], sizes = [2, 32], strides = [1, 1]} : vector<2x128xf32> to vector<2x32xf32>
    %221 = vector.extract_strided_slice %217 {offsets = [0, 64], sizes = [2, 32], strides = [1, 1]} : vector<2x128xf32> to vector<2x32xf32>
    %222 = arith.mulf %219, %185 : vector<2x32xf32>
    %223 = arith.mulf %218, %221 : vector<2x32xf32>
    %224 = arith.addf %222, %223 : vector<2x32xf32>
    %225 = math.tanh %224 : vector<2x32xf32>
    %226 = arith.mulf %220, %225 : vector<2x32xf32>
    %227 = tpu.concatenate %226, %206 in 1 : vector<2x32xf32>, vector<2x32xf32> -> vector<2x64xf32>
    %cst_47 = arith.constant dense<0.000000e+00> : vector<2x128xf32>
    %228 = tpu.matmul %227, %4, %cst_47 {dimension_numbers = #tpu.dot_dimension_numbers<[1], [0], [0], [1], [0, 0, 1, 1], [], []>} : vector<2x64xf32>, vector<64x128xf32>, vector<2x128xf32> -> vector<2x128xf32>
    %229 = vector.broadcast %5 : vector<1x128xf32> to vector<2x128xf32>
    %230 = arith.addf %228, %229 : vector<2x128xf32>
    %231 = arith.negf %230 : vector<2x128xf32>
    %232 = math.exp %231 : vector<2x128xf32>
    %cst_48 = arith.constant 1.000000e+00 : f32
    %233 = vector.broadcast %cst_48 : f32 to vector<2x128xf32>
    %234 = arith.addf %233, %232 : vector<2x128xf32>
    %235 = arith.divf %233, %234 : vector<2x128xf32>
    %236 = math.tanh %230 : vector<2x128xf32>
    %237 = vector.extract_strided_slice %235 {offsets = [0, 0], sizes = [2, 32], strides = [1, 1]} : vector<2x128xf32> to vector<2x32xf32>
    %238 = vector.extract_strided_slice %235 {offsets = [0, 32], sizes = [2, 32], strides = [1, 1]} : vector<2x128xf32> to vector<2x32xf32>
    %239 = vector.extract_strided_slice %235 {offsets = [0, 96], sizes = [2, 32], strides = [1, 1]} : vector<2x128xf32> to vector<2x32xf32>
    %240 = vector.extract_strided_slice %236 {offsets = [0, 64], sizes = [2, 32], strides = [1, 1]} : vector<2x128xf32> to vector<2x32xf32>
    %241 = arith.mulf %238, %204 : vector<2x32xf32>
    %242 = arith.mulf %237, %240 : vector<2x32xf32>
    %243 = arith.addf %241, %242 : vector<2x32xf32>
    %244 = math.tanh %243 : vector<2x32xf32>
    %245 = arith.mulf %239, %244 : vector<2x32xf32>
    %c248 = arith.constant 248 : index
    %c0_49 = arith.constant 0 : index
    %246 = vector.load %arg1[%c248, %c0_49] : memref<384x128xf32, #tpu.memory_space<vmem>>, vector<32x128xf32>
    %cst_50 = arith.constant dense<0.000000e+00> : vector<2x128xf32>
    %247 = tpu.matmul %245, %246, %cst_50 {dimension_numbers = #tpu.dot_dimension_numbers<[1], [0], [0], [1], [0, 0, 1, 1], [], []>} : vector<2x32xf32>, vector<32x128xf32>, vector<2x128xf32> -> vector<2x128xf32>
    %248 = arith.addf %209, %247 : vector<2x128xf32>
    %cst_51 = arith.constant dense<0.000000e+00> : vector<2x128xf32>
    %249 = tpu.matmul %226, %2, %cst_51 {dimension_numbers = #tpu.dot_dimension_numbers<[1], [0], [0], [1], [0, 0, 1, 1], [], []>} : vector<2x32xf32>, vector<32x128xf32>, vector<2x128xf32> -> vector<2x128xf32>
    %250 = arith.addf %35, %249 : vector<2x128xf32>
    %251 = arith.negf %250 : vector<2x128xf32>
    %252 = math.exp %251 : vector<2x128xf32>
    %cst_52 = arith.constant 1.000000e+00 : f32
    %253 = vector.broadcast %cst_52 : f32 to vector<2x128xf32>
    %254 = arith.addf %253, %252 : vector<2x128xf32>
    %255 = arith.divf %253, %254 : vector<2x128xf32>
    %256 = math.tanh %250 : vector<2x128xf32>
    %257 = vector.extract_strided_slice %255 {offsets = [0, 0], sizes = [2, 32], strides = [1, 1]} : vector<2x128xf32> to vector<2x32xf32>
    %258 = vector.extract_strided_slice %255 {offsets = [0, 32], sizes = [2, 32], strides = [1, 1]} : vector<2x128xf32> to vector<2x32xf32>
    %259 = vector.extract_strided_slice %255 {offsets = [0, 96], sizes = [2, 32], strides = [1, 1]} : vector<2x128xf32> to vector<2x32xf32>
    %260 = vector.extract_strided_slice %256 {offsets = [0, 64], sizes = [2, 32], strides = [1, 1]} : vector<2x128xf32> to vector<2x32xf32>
    %261 = arith.mulf %258, %224 : vector<2x32xf32>
    %262 = arith.mulf %257, %260 : vector<2x32xf32>
    %263 = arith.addf %261, %262 : vector<2x32xf32>
    %264 = math.tanh %263 : vector<2x32xf32>
    %265 = arith.mulf %259, %264 : vector<2x32xf32>
    %266 = tpu.concatenate %265, %245 in 1 : vector<2x32xf32>, vector<2x32xf32> -> vector<2x64xf32>
    %cst_53 = arith.constant dense<0.000000e+00> : vector<2x128xf32>
    %267 = tpu.matmul %266, %4, %cst_53 {dimension_numbers = #tpu.dot_dimension_numbers<[1], [0], [0], [1], [0, 0, 1, 1], [], []>} : vector<2x64xf32>, vector<64x128xf32>, vector<2x128xf32> -> vector<2x128xf32>
    %268 = vector.broadcast %5 : vector<1x128xf32> to vector<2x128xf32>
    %269 = arith.addf %267, %268 : vector<2x128xf32>
    %270 = arith.negf %269 : vector<2x128xf32>
    %271 = math.exp %270 : vector<2x128xf32>
    %cst_54 = arith.constant 1.000000e+00 : f32
    %272 = vector.broadcast %cst_54 : f32 to vector<2x128xf32>
    %273 = arith.addf %272, %271 : vector<2x128xf32>
    %274 = arith.divf %272, %273 : vector<2x128xf32>
    %275 = math.tanh %269 : vector<2x128xf32>
    %276 = vector.extract_strided_slice %274 {offsets = [0, 0], sizes = [2, 32], strides = [1, 1]} : vector<2x128xf32> to vector<2x32xf32>
    %277 = vector.extract_strided_slice %274 {offsets = [0, 32], sizes = [2, 32], strides = [1, 1]} : vector<2x128xf32> to vector<2x32xf32>
    %278 = vector.extract_strided_slice %274 {offsets = [0, 96], sizes = [2, 32], strides = [1, 1]} : vector<2x128xf32> to vector<2x32xf32>
    %279 = vector.extract_strided_slice %275 {offsets = [0, 64], sizes = [2, 32], strides = [1, 1]} : vector<2x128xf32> to vector<2x32xf32>
    %280 = arith.mulf %277, %243 : vector<2x32xf32>
    %281 = arith.mulf %276, %279 : vector<2x32xf32>
    %282 = arith.addf %280, %281 : vector<2x32xf32>
    %283 = math.tanh %282 : vector<2x32xf32>
    %284 = arith.mulf %278, %283 : vector<2x32xf32>
    %c280 = arith.constant 280 : index
    %c0_55 = arith.constant 0 : index
    %285 = vector.load %arg1[%c280, %c0_55] : memref<384x128xf32, #tpu.memory_space<vmem>>, vector<32x128xf32>
    %cst_56 = arith.constant dense<0.000000e+00> : vector<2x128xf32>
    %286 = tpu.matmul %284, %285, %cst_56 {dimension_numbers = #tpu.dot_dimension_numbers<[1], [0], [0], [1], [0, 0, 1, 1], [], []>} : vector<2x32xf32>, vector<32x128xf32>, vector<2x128xf32> -> vector<2x128xf32>
    %287 = arith.addf %248, %286 : vector<2x128xf32>
    %cst_57 = arith.constant dense<0.000000e+00> : vector<2x128xf32>
    %288 = tpu.matmul %265, %2, %cst_57 {dimension_numbers = #tpu.dot_dimension_numbers<[1], [0], [0], [1], [0, 0, 1, 1], [], []>} : vector<2x32xf32>, vector<32x128xf32>, vector<2x128xf32> -> vector<2x128xf32>
    %289 = arith.addf %40, %288 : vector<2x128xf32>
    %290 = arith.negf %289 : vector<2x128xf32>
    %291 = math.exp %290 : vector<2x128xf32>
    %cst_58 = arith.constant 1.000000e+00 : f32
    %292 = vector.broadcast %cst_58 : f32 to vector<2x128xf32>
    %293 = arith.addf %292, %291 : vector<2x128xf32>
    %294 = arith.divf %292, %293 : vector<2x128xf32>
    %295 = math.tanh %289 : vector<2x128xf32>
    %296 = vector.extract_strided_slice %294 {offsets = [0, 0], sizes = [2, 32], strides = [1, 1]} : vector<2x128xf32> to vector<2x32xf32>
    %297 = vector.extract_strided_slice %294 {offsets = [0, 32], sizes = [2, 32], strides = [1, 1]} : vector<2x128xf32> to vector<2x32xf32>
    %298 = vector.extract_strided_slice %294 {offsets = [0, 96], sizes = [2, 32], strides = [1, 1]} : vector<2x128xf32> to vector<2x32xf32>
    %299 = vector.extract_strided_slice %295 {offsets = [0, 64], sizes = [2, 32], strides = [1, 1]} : vector<2x128xf32> to vector<2x32xf32>
    %300 = arith.mulf %297, %263 : vector<2x32xf32>
    %301 = arith.mulf %296, %299 : vector<2x32xf32>
    %302 = arith.addf %300, %301 : vector<2x32xf32>
    %303 = math.tanh %302 : vector<2x32xf32>
    %304 = arith.mulf %298, %303 : vector<2x32xf32>
    %305 = tpu.concatenate %304, %284 in 1 : vector<2x32xf32>, vector<2x32xf32> -> vector<2x64xf32>
    %cst_59 = arith.constant dense<0.000000e+00> : vector<2x128xf32>
    %306 = tpu.matmul %305, %4, %cst_59 {dimension_numbers = #tpu.dot_dimension_numbers<[1], [0], [0], [1], [0, 0, 1, 1], [], []>} : vector<2x64xf32>, vector<64x128xf32>, vector<2x128xf32> -> vector<2x128xf32>
    %307 = vector.broadcast %5 : vector<1x128xf32> to vector<2x128xf32>
    %308 = arith.addf %306, %307 : vector<2x128xf32>
    %309 = arith.negf %308 : vector<2x128xf32>
    %310 = math.exp %309 : vector<2x128xf32>
    %cst_60 = arith.constant 1.000000e+00 : f32
    %311 = vector.broadcast %cst_60 : f32 to vector<2x128xf32>
    %312 = arith.addf %311, %310 : vector<2x128xf32>
    %313 = arith.divf %311, %312 : vector<2x128xf32>
    %314 = math.tanh %308 : vector<2x128xf32>
    %315 = vector.extract_strided_slice %313 {offsets = [0, 0], sizes = [2, 32], strides = [1, 1]} : vector<2x128xf32> to vector<2x32xf32>
    %316 = vector.extract_strided_slice %313 {offsets = [0, 32], sizes = [2, 32], strides = [1, 1]} : vector<2x128xf32> to vector<2x32xf32>
    %317 = vector.extract_strided_slice %313 {offsets = [0, 96], sizes = [2, 32], strides = [1, 1]} : vector<2x128xf32> to vector<2x32xf32>
    %318 = vector.extract_strided_slice %314 {offsets = [0, 64], sizes = [2, 32], strides = [1, 1]} : vector<2x128xf32> to vector<2x32xf32>
    %319 = arith.mulf %316, %282 : vector<2x32xf32>
    %320 = arith.mulf %315, %318 : vector<2x32xf32>
    %321 = arith.addf %319, %320 : vector<2x32xf32>
    %322 = math.tanh %321 : vector<2x32xf32>
    %323 = arith.mulf %317, %322 : vector<2x32xf32>
    %c312 = arith.constant 312 : index
    %c0_61 = arith.constant 0 : index
    %324 = vector.load %arg1[%c312, %c0_61] : memref<384x128xf32, #tpu.memory_space<vmem>>, vector<32x128xf32>
    %cst_62 = arith.constant dense<0.000000e+00> : vector<2x128xf32>
    %325 = tpu.matmul %323, %324, %cst_62 {dimension_numbers = #tpu.dot_dimension_numbers<[1], [0], [0], [1], [0, 0, 1, 1], [], []>} : vector<2x32xf32>, vector<32x128xf32>, vector<2x128xf32> -> vector<2x128xf32>
    %326 = arith.addf %287, %325 : vector<2x128xf32>
    %cst_63 = arith.constant dense<0.000000e+00> : vector<2x128xf32>
    %327 = tpu.matmul %304, %2, %cst_63 {dimension_numbers = #tpu.dot_dimension_numbers<[1], [0], [0], [1], [0, 0, 1, 1], [], []>} : vector<2x32xf32>, vector<32x128xf32>, vector<2x128xf32> -> vector<2x128xf32>
    %328 = arith.addf %45, %327 : vector<2x128xf32>
    %329 = arith.negf %328 : vector<2x128xf32>
    %330 = math.exp %329 : vector<2x128xf32>
    %cst_64 = arith.constant 1.000000e+00 : f32
    %331 = vector.broadcast %cst_64 : f32 to vector<2x128xf32>
    %332 = arith.addf %331, %330 : vector<2x128xf32>
    %333 = arith.divf %331, %332 : vector<2x128xf32>
    %334 = math.tanh %328 : vector<2x128xf32>
    %335 = vector.extract_strided_slice %333 {offsets = [0, 0], sizes = [2, 32], strides = [1, 1]} : vector<2x128xf32> to vector<2x32xf32>
    %336 = vector.extract_strided_slice %333 {offsets = [0, 32], sizes = [2, 32], strides = [1, 1]} : vector<2x128xf32> to vector<2x32xf32>
    %337 = vector.extract_strided_slice %333 {offsets = [0, 96], sizes = [2, 32], strides = [1, 1]} : vector<2x128xf32> to vector<2x32xf32>
    %338 = vector.extract_strided_slice %334 {offsets = [0, 64], sizes = [2, 32], strides = [1, 1]} : vector<2x128xf32> to vector<2x32xf32>
    %339 = arith.mulf %336, %302 : vector<2x32xf32>
    %340 = arith.mulf %335, %338 : vector<2x32xf32>
    %341 = arith.addf %339, %340 : vector<2x32xf32>
    %342 = math.tanh %341 : vector<2x32xf32>
    %343 = arith.mulf %337, %342 : vector<2x32xf32>
    %344 = tpu.concatenate %343, %323 in 1 : vector<2x32xf32>, vector<2x32xf32> -> vector<2x64xf32>
    %cst_65 = arith.constant dense<0.000000e+00> : vector<2x128xf32>
    %345 = tpu.matmul %344, %4, %cst_65 {dimension_numbers = #tpu.dot_dimension_numbers<[1], [0], [0], [1], [0, 0, 1, 1], [], []>} : vector<2x64xf32>, vector<64x128xf32>, vector<2x128xf32> -> vector<2x128xf32>
    %346 = vector.broadcast %5 : vector<1x128xf32> to vector<2x128xf32>
    %347 = arith.addf %345, %346 : vector<2x128xf32>
    %348 = arith.negf %347 : vector<2x128xf32>
    %349 = math.exp %348 : vector<2x128xf32>
    %cst_66 = arith.constant 1.000000e+00 : f32
    %350 = vector.broadcast %cst_66 : f32 to vector<2x128xf32>
    %351 = arith.addf %350, %349 : vector<2x128xf32>
    %352 = arith.divf %350, %351 : vector<2x128xf32>
    %353 = math.tanh %347 : vector<2x128xf32>
    %354 = vector.extract_strided_slice %352 {offsets = [0, 0], sizes = [2, 32], strides = [1, 1]} : vector<2x128xf32> to vector<2x32xf32>
    %355 = vector.extract_strided_slice %352 {offsets = [0, 32], sizes = [2, 32], strides = [1, 1]} : vector<2x128xf32> to vector<2x32xf32>
    %356 = vector.extract_strided_slice %352 {offsets = [0, 96], sizes = [2, 32], strides = [1, 1]} : vector<2x128xf32> to vector<2x32xf32>
    %357 = vector.extract_strided_slice %353 {offsets = [0, 64], sizes = [2, 32], strides = [1, 1]} : vector<2x128xf32> to vector<2x32xf32>
    %358 = arith.mulf %355, %321 : vector<2x32xf32>
    %359 = arith.mulf %354, %357 : vector<2x32xf32>
    %360 = arith.addf %358, %359 : vector<2x32xf32>
    %361 = math.tanh %360 : vector<2x32xf32>
    %362 = arith.mulf %356, %361 : vector<2x32xf32>
    %c344 = arith.constant 344 : index
    %c0_67 = arith.constant 0 : index
    %363 = vector.load %arg1[%c344, %c0_67] : memref<384x128xf32, #tpu.memory_space<vmem>>, vector<32x128xf32>
    %cst_68 = arith.constant dense<0.000000e+00> : vector<2x128xf32>
    %364 = tpu.matmul %362, %363, %cst_68 {dimension_numbers = #tpu.dot_dimension_numbers<[1], [0], [0], [1], [0, 0, 1, 1], [], []>} : vector<2x32xf32>, vector<32x128xf32>, vector<2x128xf32> -> vector<2x128xf32>
    %365 = arith.addf %326, %364 : vector<2x128xf32>
    %366 = vector.extract_strided_slice %365 {offsets = [0, 0], sizes = [2, 8], strides = [1, 1]} : vector<2x128xf32> to vector<2x8xf32>
    %c0_69 = arith.constant 0 : index
    %c0_70 = arith.constant 0 : index
    %367 = vector.load %arg2[%c0_69, %c0_70] : memref<2x8xf32, #tpu.memory_space<vmem>>, vector<2x8xf32>
    tpu.vector_store %arg2[%c0_69, %c0_70], %366 {strides = array<i32>} : memref<2x8xf32, #tpu.memory_space<vmem>>, vector<2x8xf32>,
    return
  }
}

</mosaic_0001>

<bundles_post_ra>
// kernel: fire_predictor_forward.1
= control target key start
LH: loop header
LB: loop body
LE: loop exit
PB: predicated region body
PF: predicated region fallthrough
CT: control target
= control target key end

     0   :  { %7 = vsyncpa [#allocation3], 0  ;;  %s2224_s0 = inlined_call_operand.hbm [shape: f32[2,8,8], index: 0, kind: input, shape index: {}]   ;;  %s2225_s1 = inlined_call_operand.hbm [shape: f32[384,128], index: 1, kind: input, shape index: {}]   ;;  %s2226_s2 = inlined_call_operand.hbm [shape: f32[2,8], index: 2, kind: output, shape index: {}]  }
   0x1   :  { %8 = vsyncpa [#allocation6], 0 }
   0x2   :  { %9 = vsyncpa [#allocation4], 0  ;;  %s14_s11 = sshll.u32 %s2224_s0, 4  ;;  %s1820_s12 = smov [#allocation2]   ;;  %s15_s11 = int_to_ptr.hbm [resolvable:$true] %s14_s11 }
   0x3   :  { %s16_s13 = sshll.u32 %s1820_s12, 4  ;;  %s27_s16 = sshll.u32 %s2225_s1, 4  ;;  %s17_s13 = int_to_ptr.vmem [resolvable:$true] %s16_s13  ;;  %s28_s16 = int_to_ptr.hbm [resolvable:$true] %s27_s16 }
   0x4   :  { %s1821_s17 = smov 128   ;;  %s1822_s18 = smov 8  }
   0x5   :  { %22 = dma.hbm_to_vmem [thread:$0]  %s15_s11, 256, %s17_s13, [#allocation3], %s1821_s17, %s1821_s17, %s1822_s18  }
   0x6   :  { %s1823_s19 = smov [#allocation5]  }
   0x7   :  { %s29_s20 = sshll.u32 %s1823_s19, 4  ;;  %s30_s20 = int_to_ptr.vmem [resolvable:$true] %s29_s20 }
   0x8   :  { %35 = dma.hbm_to_vmem [thread:$0]  %s28_s16, 6144, %s30_s20, [#allocation6], %s1821_s17, %s1821_s17, %s1822_s18  }
   0x9   :  { %1814 = dma.done.wait [#allocation3], 256  }
   0xa   :  { %1815 = vsyncadd [#allocation3], 4294967040 }
   0xb   :  { %1816 = dma.done.wait [#allocation6], 6144  }
   0xc   :  { %1817 = vsyncadd [#allocation6], 4294961152  ;;  %v46_v0 = vld [vmem:[#allocation5] sm:$0xff]  ;;  %v1849_v1 = vld [vmem:[#allocation2] sm:$0xff]  ;;  %vm65_vm0 = vcmask 1041409   ;;  %vm67_vm1 = vcmask 64512  }
   0xd   :  { %v1851_v2 = vld [vmem:[#allocation2 + $0x8] sm:$0xff]  ;;  %85 = vmatpush.msra.mxu3 %v46_v0  ;;  %184 = vmatpush.msra.mxu0 %v46_v0  ;;  %v164_v4 = vrot.slane %v1849_v1, 4  ;;  %v1856_v6 = vld [vmem:[#allocation5 + $0x20] sm:$0xff]  ;;  %v1866_v10 = vld [vmem:[#allocation5 + $0x10] sm:$0xff]  ;;  %v1824_v12 = vmov 0.0   ;;  %s1825_s0 = smov 64  }
   0xe   :  { %v64_v3 = vrot.slane %v1851_v2, 7  ;;  %v165_v5 = vrot.slane %v1851_v2, 3  ;;  %v1859_v7 = vld [vmem:[#allocation5 + $0x18] sm:$0xff]  ;;  %109 = vmatpush.msra.mxu1 %v46_v0  ;;  %134 = vmatpush.msra.mxu2 %v46_v0  ;;  %v1869_v11 = vld [vmem:[#allocation5 + $0x8] sm:$0xff]  ;;  %s1826_s1 = smov 32   ;;  %v139_v39 = vrot.slane %v1849_v1, 3 }
   0xf   :  { %283 = vmatpush.msrb.mxu0 %v1856_v6  ;;  %159 = vmatpush.msrb.mxu3 %v46_v0  ;;  %v1875_v14 = vld [vmem:[#allocation5 + $0x28] ss:$0 sm:$0xff]  ;;  %v140_v40 = vrot.slane %v1851_v2, 2  ;;  %v90_v41 = vrot.slane %v1849_v1, 1  ;;  %v1895_v45 = vld [vmem:[#allocation5 + $0x60] sm:$0xff]  ;;  %v239_v46 = vrot.slane %v1849_v1, 7 }
  0x10   :  { %v66_v8 = vsel %vm65_vm0, %v64_v3, %v1849_v1  ;;  %v166_v9 = vsel %vm65_vm0, %v165_v5, %v164_v4  ;;  %209 = vmatpush.msrb.mxu1 %v46_v0  ;;  %234 = vmatpush.msrb.mxu2 %v46_v0  ;;  %v1887_v42 = vld [vmem:[#allocation5 + $0x68] sm:$0xff]  ;;  %v240_v47 = vrot.slane %v1851_v2, 6  ;;  %v189_v48 = vrot.slane %v1849_v1, 5  ;;  %v1903_v50 = vld [vmem:[#allocation5 + $0x58] sm:$0xff]  ;;  %v1908_v51 = vld [vmem:[#allocation5 + $0x50] sm:$0xff]  ;;  %s1827_s21 = smov [#allocation7]  }
  0x11   :  { %1552 = vmatmul.msk.f32.vlgmr.msra.gmra.mxu3 %vm67_vm1, %v66_v8  ;;  %1556 = vmatmul.msk.f32.vlgmr.msra.gmra.mxu0 %vm67_vm1, %v166_v9  ;;  %v141_v43 = vsel %vm65_vm0, %v140_v40, %v139_v39  ;;  %v91_v44 = vsel %vm65_vm0, %v1851_v2, %v90_v41  ;;  %v190_v49 = vrot.slane %v1851_v2, 4  ;;  %v1915_v54 = vld [vmem:[#allocation5 + $0x48] sm:$0xff]  ;;  %v1922_v55 = vld [vmem:[#allocation5 + $0x40] sm:$0xff]  ;;  %v1926_v56 = vld [vmem:[#allocation5 + $0x38] sm:$0xff]  ;;  %vm267_vm6 = vcmask 261120   ;;  %s1539_s22 = sshll.u32 %s1827_s21, 4  ;;  %s1540_s22 = int_to_ptr.vmem [resolvable:$true] %s1539_s22 }
  0x12   :  { %284 = vmatpush.msrb.mxu0 %v1859_v7  ;;  %259 = vmatpush.msra.mxu3 %v46_v0  ;;  %v241_v52 = vsel %vm65_vm0, %v240_v47, %v239_v46  ;;  %v1937_v59 = vld [vmem:[#allocation5 + $0x30] sm:$0xff]  ;;  %vm335_vm7 = vcmask 523264   ;;  %s1541_s25 = sshll.u32 %s2226_s2, 4  ;;  %s1542_s25 = int_to_ptr.hbm [resolvable:$true] %s1541_s25 }
  0x13   :  { %1553 = vmatmul.msk.f32.vlgmr.msra.gmra.mxu1 %vm67_vm1, %v91_v44  ;;  %v191_v53 = vsel %vm65_vm0, %v190_v49, %v189_v48  ;;  %v1979_v9 = vld [vmem:[#allocation5 + $0x70] ss:$0 sm:$0xff] }
  0x14   :  { %285 = vmatpush.msrb.mxu0 %v1866_v10  ;;  %347 = vmatpush.msra.mxu1 %v1887_v42 }
  0x16   :  { %286 = vmatpush.msrb.mxu0 %v1869_v11  ;;  %348 = vmatpush.msra.mxu1 %v1895_v45 }
  0x18   :  { %505 = vmatpush.msra.mxu0 %v1887_v42  ;;  %349 = vmatpush.msra.mxu1 %v1903_v50 }
  0x19   :  { %287 = vmatmul.f32.vlgmr.msrb.gmra.mxu0 %v1824_v12  ;;  %1555 = vmatmul.msk.f32.vlgmr.msrb.gmra.mxu3 %vm67_vm1, %v141_v43 }
  0x1a   :  { %440 = vmatpush.msrb.mxu3 %v1856_v6  ;;  %506 = vmatpush.msra.mxu0 %v1895_v45 }
  0x1b   :  { %350 = vmatpush.msra.mxu1 %v1908_v51 }
  0x1c   :  { %441 = vmatpush.msrb.mxu3 %v1859_v7  ;;  %507 = vmatpush.msra.mxu0 %v1903_v50 }
  0x1d   :  { %1557 = vmatmul.msk.f32.vlgmr.msrb.gmra.mxu1 %vm67_vm1, %v191_v53 }
  0x1e   :  { %442 = vmatpush.msrb.mxu3 %v1866_v10  ;;  %508 = vmatpush.msra.mxu0 %v1908_v51 }
  0x1f   :  { %351 = vmatpush.msra.mxu1 %v1915_v54 }
  0x20   :  { %443 = vmatpush.msrb.mxu3 %v1869_v11  ;;  %509 = vmatpush.msra.mxu0 %v1915_v54 }
  0x21   :  { %1559 = vmatmul.msk.f32.vlgmr.msra.gmra.mxu3 %vm67_vm1, %v241_v52  ;;  %352 = vmatpush.msra.mxu1 %v1922_v55 }
  0x22   :  { %598 = vmatpush.msra.mxu3 %v1856_v6  ;;  %510 = vmatpush.msra.mxu0 %v1922_v55 }
  0x23   :  { %353 = vmatpush.msra.mxu1 %v1926_v56 }
  0x24   :  { %599 = vmatpush.msra.mxu3 %v1859_v7  ;;  %511 = vmatpush.msra.mxu0 %v1926_v56 }
  0x25   :  { %354 = vmatpush.msra.mxu1 %v1937_v59 }
  0x26   :  { %600 = vmatpush.msra.mxu3 %v1866_v10  ;;  %512 = vmatpush.msra.mxu0 %v1937_v59 }
  0x27   :  { %663 = vmatpush.msrb.mxu1 %v1887_v42 }
  0x28   :  { %601 = vmatpush.msra.mxu3 %v1869_v11  ;;  %821 = vmatpush.msrb.mxu0 %v1887_v42 }
  0x29   :  { %664 = vmatpush.msrb.mxu1 %v1895_v45 }
  0x2a   :  { %822 = vmatpush.msrb.mxu0 %v1895_v45 }
  0x2b   :  { %665 = vmatpush.msrb.mxu1 %v1903_v50 }
  0x2c   :  { %823 = vmatpush.msrb.mxu0 %v1903_v50 }
  0x2d   :  { %666 = vmatpush.msrb.mxu1 %v1908_v51 }
  0x2e   :  { %824 = vmatpush.msrb.mxu0 %v1908_v51 }
  0x2f   :  { %667 = vmatpush.msrb.mxu1 %v1915_v54 }
  0x30   :  { %825 = vmatpush.msrb.mxu0 %v1915_v54 }
  0x31   :  { %668 = vmatpush.msrb.mxu1 %v1922_v55 }
  0x32   :  { %826 = vmatpush.msrb.mxu0 %v1922_v55 }
  0x33   :  { %669 = vmatpush.msrb.mxu1 %v1926_v56 }
  0x34   :  { %827 = vmatpush.msrb.mxu0 %v1926_v56 }
  0x35   :  { %670 = vmatpush.msrb.mxu1 %v1937_v59 }
  0x36   :  { %828 = vmatpush.msrb.mxu0 %v1937_v59 }
  0x8e   :  { %v1873_v13 = vpop.f32.mrf.mxu0 }
  0x90   :  { %v111_v63 = vpop.f32.mrf.mxu1 }
  0x91   :  { %v112_v4 = vadd.f32 %v1875_v14, %v111_v63 }
  0x94   :  { %v87_v15 = vpop.f32.mrf.mxu3 }
  0x95   :  { %v88_v16 = vadd.f32 %v1875_v14, %v87_v15 }
  0x96   :  { %v288_v17 = vpop.f32.mrf.mxu0 }
  0x97   :  { %v291_v18 = vadd.f32 %v288_v17, %v88_v16 }
  0x99   :  { %1610 = vtanh.f32 %v291_v18  ;;  %v1560_v20 = vmul.f32 -1.442695, %v291_v18 }
  0x9a   :  { %v1976_v3 = vpop.f32.mrf.mxu1 }
  0x9b   :  { %1612 = vpow2.f32 %v1560_v20 }
  0x9c   :  { %v1972_v62 = vpop.f32.mrf.mxu3 }
  0x9f   :  { %v1611_v19 = vpop.eup %1610 }
  0xa0   :  { %314 = vrot.lane.b32.xlu0 %v1611_v19, %s1825_s0 }
  0xa1   :  { %v1613_v21 = vpop.eup %1612 }
  0xa2   :  { %v295_v22 = vadd.f32 1.0, %v1613_v21 }
  0xa4   :  { %1614 = vrcp.f32 %v295_v22  ;;  %v307_v28 = vand.u32 2147483648, %v295_v22  ;;  %vm301_vm3 = vweird.f32 %v295_v22  ;;  %v305_v29 = vand.u32 2147483647, %v295_v22  ;;  %v1974_v0 = vpop.f32.mrf.mxu3 }
  0xa6   :  { %v308_v31 = vor.u32 1.1754944e-38, %v307_v28  ;;  %vm306_vm5 = vcmp.eq.f32.partialorder %v305_v29, 8.507059e+37 }
  0xaa   :  { %v1615_v23 = vpop.eup %1614 }
  0xab   :  { %v297_v24 = vmul.f32 %v1615_v23, %v295_v22  ;;  %vm302_vm2 = vweird.f32 %v1615_v23 }
  0xac   :  { %vm303_vm4 = vmor %vm301_vm3, %vm302_vm2 }
  0xad   :  { %v298_v25 = vsub.f32 1.0, %v297_v24 }
  0xaf   :  { %v299_v26 = vmul.f32 %v1615_v23, %v298_v25 }
  0xb1   :  { %v300_v27 = vadd.f32 %v1615_v23, %v299_v26 }
  0xb3   :  { %v304_v30 = vsel %vm303_vm4, %v1615_v23, %v300_v27 }
  0xb4   :  { %v309_v33 = vsel %vm306_vm5, %v308_v31, %v304_v30 }
  0xb5   :  { %v312_v35 = vmul.f32 0.0, %v309_v33 }
 0x112   :  { %v315_v32 = vpop.permute.xlu0 %314 }
 0x113   :  { %v317_v34 = vmul.f32 %v315_v32, %v309_v33 }
 0x115   :  { %319 = vrot.lane.b32.xlu0 %v317_v34, %s1826_s1 }
 0x187   :  { %v320_v36 = vpop.permute.xlu0 %319 }
 0x188   :  { %v1880_v37 = vadd.f32 %v320_v36, %v312_v35 }
 0x18a   :  { %1616 = vtanh.f32 %v1880_v37 }
 0x190   :  { %v1617_v38 = vpop.eup %1616 }
 0x191   :  { %325 = vrot.lane.b32.xlu1 %v1617_v38, %s1825_s0 }
 0x203   :  { %v326_v57 = vpop.permute.xlu1 %325 }
 0x204   :  { %v328_v58 = vmul.f32 %v326_v57, %v309_v33 }
 0x206   :  { %330 = vrot.lane.b32.xlu1 %v328_v58, %s1826_s1 }
 0x278   :  { %v331_v60 = vpop.permute.xlu1 %330 }
 0x279   :  { %v333_v61 = vsel %vm267_vm6, %v331_v60, 0.0  ;;  %1564 = vmatmul.msk.f32.vlgmr.msrb.gmra.mxu3 %vm267_vm6, %v331_v60 }
 0x27a   :  { %1561 = vmatmul.msk.f32.vlgmr.msra.gmra.mxu1 %vm335_vm7, %v333_v61  ;;  %756 = vmatpush.msrb.mxu3 %v1856_v6 }
 0x27b   :  { %979 = vmatpush.msra.mxu1 %v1887_v42 }
 0x27c   :  { %757 = vmatpush.msrb.mxu3 %v1859_v7 }
 0x27d   :  { %980 = vmatpush.msra.mxu1 %v1895_v45 }
 0x27e   :  { %758 = vmatpush.msrb.mxu3 %v1866_v10 }
 0x27f   :  { %981 = vmatpush.msra.mxu1 %v1903_v50 }
 0x280   :  { %759 = vmatpush.msrb.mxu3 %v1869_v11 }
 0x281   :  { %982 = vmatpush.msra.mxu1 %v1908_v51 }
 0x283   :  { %983 = vmatpush.msra.mxu1 %v1915_v54 }
 0x285   :  { %984 = vmatpush.msra.mxu1 %v1922_v55 }
 0x287   :  { %985 = vmatpush.msra.mxu1 %v1926_v56 }
 0x289   :  { %986 = vmatpush.msra.mxu1 %v1937_v59 }
 0x2f7   :  { %v356_v12 = vpop.f32.mrf.mxu1 }
 0x2f8   :  { %v357_v15 = vadd.f32 %v1979_v9, %v356_v12 }
 0x2fa   :  { %v1562_v19 = vmul.f32 -1.442695, %v357_v15 }
 0x2fc   :  { %v445_v5 = vpop.f32.mrf.mxu3 }
 0x2fd   :  { %v448_v8 = vadd.f32 %v445_v5, %v112_v4 }
 0x2ff   :  { %1618 = vtanh.f32 %v448_v8  ;;  %v1565_v18 = vmul.f32 -1.442695, %v448_v8 }
 0x300   :  { %1620 = vtanh.f32 %v357_v15  ;;  %v115_v15 = vrot.slane %v1851_v2, 1 }
 0x301   :  { %1622 = vpow2.f32 %v1565_v18 }
 0x302   :  { %1624 = vpow2.f32 %v1562_v19 }
 0x305   :  { %v1619_v16 = vpop.eup %1618 }
 0x306   :  { %471 = vrot.lane.b32.xlu2 %v1619_v16, %s1825_s0  ;;  %v1621_v17 = vpop.eup %1620 }
 0x307   :  { %v1623_v20 = vpop.eup %1622 }
 0x308   :  { %v452_v21 = vadd.f32 1.0, %v1623_v20  ;;  %v1625_v22 = vpop.eup %1624 }
 0x309   :  { %v362_v23 = vadd.f32 1.0, %v1625_v22 }
 0x30a   :  { %1626 = vrcp.f32 %v452_v21  ;;  %v464_v32 = vand.u32 2147483648, %v452_v21  ;;  %vm458_vm9 = vweird.f32 %v452_v21  ;;  %v462_v33 = vand.u32 2147483647, %v452_v21 }
 0x30b   :  { %1628 = vrcp.f32 %v362_v23  ;;  %v374_v43 = vand.u32 2147483648, %v362_v23  ;;  %vm368_vm13 = vweird.f32 %v362_v23  ;;  %v372_v44 = vand.u32 2147483647, %v362_v23 }
 0x30c   :  { %v465_v36 = vor.u32 1.1754944e-38, %v464_v32  ;;  %vm463_vm11 = vcmp.eq.f32.partialorder %v462_v33, 8.507059e+37 }
 0x30d   :  { %v375_v47 = vor.u32 1.1754944e-38, %v374_v43  ;;  %vm373_vm15 = vcmp.eq.f32.partialorder %v372_v44, 8.507059e+37 }
 0x30e   :  { %381 = vrot.lane.b32.xlu2 %v1621_v17, %s1825_s0 }
 0x310   :  { %v1627_v24 = vpop.eup %1626 }
 0x311   :  { %v454_v25 = vmul.f32 %v1627_v24, %v452_v21  ;;  %v1629_v27 = vpop.eup %1628  ;;  %vm459_vm8 = vweird.f32 %v1627_v24 }
 0x312   :  { %v364_v29 = vmul.f32 %v1629_v27, %v362_v23  ;;  %vm460_vm10 = vmor %vm458_vm9, %vm459_vm8  ;;  %vm369_vm12 = vweird.f32 %v1629_v27 }
 0x313   :  { %v455_v26 = vsub.f32 1.0, %v454_v25  ;;  %vm370_vm14 = vmor %vm368_vm13, %vm369_vm12 }
 0x314   :  { %v365_v31 = vsub.f32 1.0, %v364_v29 }
 0x315   :  { %v456_v28 = vmul.f32 %v1627_v24, %v455_v26 }
 0x316   :  { %v366_v35 = vmul.f32 %v1629_v27, %v365_v31 }
 0x317   :  { %v457_v30 = vadd.f32 %v1627_v24, %v456_v28 }
 0x318   :  { %v367_v41 = vadd.f32 %v1629_v27, %v366_v35 }
 0x319   :  { %v461_v34 = vsel %vm460_vm10, %v1627_v24, %v457_v30 }
 0x31a   :  { %v466_v39 = vsel %vm463_vm11, %v465_v36, %v461_v34  ;;  %v371_v46 = vsel %vm370_vm14, %v1629_v27, %v367_v41 }
 0x31b   :  { %v376_v49 = vsel %vm373_vm15, %v375_v47, %v371_v46  ;;  %v469_v53 = vmul.f32 %v466_v39, %v1880_v37  ;;  %v114_v37 = vrot.slane %v1849_v1, 2 }
 0x31c   :  { %v379_v60 = vmul.f32 0.0, %v376_v49 }
 0x31d   :  { %v116_v16 = vsel %vm65_vm0, %v115_v15, %v114_v37 }
 0x31e   :  { %1554 = vmatmul.msk.f32.vlgmr.msra.gmra.mxu2 %vm67_vm1, %v116_v16 }
 0x360   :  { %v472_v38 = vpop.permute.xlu2 %471 }
 0x361   :  { %v474_v40 = vmul.f32 %v472_v38, %v466_v39 }
 0x363   :  { %476 = vrot.lane.b32.xlu0 %v474_v40, %s1826_s1 }
 0x368   :  { %v382_v48 = vpop.permute.xlu2 %381 }
 0x369   :  { %v384_v52 = vmul.f32 %v382_v48, %v376_v49 }
 0x36b   :  { %386 = vrot.lane.b32.xlu1 %v384_v52, %s1826_s1 }
 0x3a1   :  { %v136_v20 = vpop.f32.mrf.mxu2 }
 0x3a2   :  { %v137_v21 = vadd.f32 %v1875_v14, %v136_v20 }
 0x3d5   :  { %v477_v57 = vpop.permute.xlu0 %476 }
 0x3d6   :  { %v1987_v58 = vadd.f32 %v477_v57, %v469_v53 }
 0x3d8   :  { %1630 = vtanh.f32 %v1987_v58 }
 0x3dd   :  { %v387_v61 = vpop.permute.xlu1 %386 }
 0x3de   :  { %v1631_v63 = vpop.eup %1630  ;;  %v1990_v4 = vadd.f32 %v387_v61, %v379_v60 }
 0x3df   :  { %482 = vrot.lane.b32.xlu2 %v1631_v63, %s1825_s0 }
 0x3e0   :  { %1632 = vtanh.f32 %v1990_v4 }
 0x3e6   :  { %v1633_v5 = vpop.eup %1632 }
 0x3e7   :  { %392 = vrot.lane.b32.xlu0 %v1633_v5, %s1825_s0 }
 0x439   :  { %v483_v8 = vpop.permute.xlu2 %482 }
 0x43a   :  { %v485_v12 = vmul.f32 %v483_v8, %v466_v39 }
 0x43c   :  { %487 = vrot.lane.b32.xlu1 %v485_v12, %s1826_s1 }
 0x459   :  { %v393_v17 = vpop.permute.xlu0 %392 }
 0x45a   :  { %v2000_v18 = vmul.f32 %v393_v17, %v376_v49 }
 0x45c   :  { %490 = vrot.lane.b32.xlu2 %v2000_v18, %s1825_s0 }
 0x4ae   :  { %v488_v19 = vpop.permute.xlu1 %487 }
 0x4af   :  { %1569 = vmatmul.msk.f32.vlgmr.msra.gmra.mxu3 %vm267_vm6, %v488_v19 }
 0x4b0   :  { %914 = vmatpush.msra.mxu3 %v1856_v6 }
 0x4b2   :  { %915 = vmatpush.msra.mxu3 %v1859_v7 }
 0x4b4   :  { %916 = vmatpush.msra.mxu3 %v1866_v10 }
 0x4b6   :  { %v491_v1 = vpop.permute.xlu2 %490  ;;  %917 = vmatpush.msra.mxu3 %v1869_v11 }
 0x4b7   :  { %v493_v2 = vsel %vm267_vm6, %v488_v19, %v491_v1 }
 0x4b8   :  { %1566 = vmatmul.msk.f32.vlgmr.msra.gmra.mxu0 %vm335_vm7, %v493_v2 }
 0x4b9   :  { %1137 = vmatpush.msra.mxu0 %v1887_v42 }
 0x4bb   :  { %1138 = vmatpush.msra.mxu0 %v1895_v45 }
 0x4bd   :  { %1139 = vmatpush.msra.mxu0 %v1903_v50 }
 0x4bf   :  { %1140 = vmatpush.msra.mxu0 %v1908_v51 }
 0x4c1   :  { %1141 = vmatpush.msra.mxu0 %v1915_v54 }
 0x4c3   :  { %1142 = vmatpush.msra.mxu0 %v1922_v55 }
 0x4c5   :  { %1143 = vmatpush.msra.mxu0 %v1926_v56 }
 0x4c7   :  { %1144 = vmatpush.msra.mxu0 %v1937_v59 }
 0x532   :  { %v603_v22 = vpop.f32.mrf.mxu3 }
 0x533   :  { %v606_v23 = vadd.f32 %v603_v22, %v137_v21 }
 0x535   :  { %1634 = vtanh.f32 %v606_v23  ;;  %v514_v24 = vpop.f32.mrf.mxu0  ;;  %v1570_v28 = vmul.f32 -1.442695, %v606_v23 }
 0x536   :  { %v515_v25 = vadd.f32 %v1979_v9, %v514_v24 }
 0x538   :  { %1636 = vtanh.f32 %v515_v25  ;;  %v1567_v29 = vmul.f32 -1.442695, %v515_v25 }
 0x539   :  { %1638 = vpow2.f32 %v1570_v28 }
 0x53a   :  { %1640 = vpow2.f32 %v1567_v29  ;;  %v162_v29 = vadd.f32 %v1875_v14, %v1972_v62 }
 0x53b   :  { %v1635_v26 = vpop.eup %1634 }
 0x53c   :  { %629 = vrot.lane.b32.xlu0 %v1635_v26, %s1825_s0 }
 0x53e   :  { %v1637_v27 = vpop.eup %1636 }
 0x53f   :  { %539 = vrot.lane.b32.xlu1 %v1637_v27, %s1825_s0  ;;  %v1639_v30 = vpop.eup %1638 }
 0x540   :  { %v1641_v31 = vpop.eup %1640  ;;  %v610_v32 = vadd.f32 1.0, %v1639_v30 }
 0x541   :  { %v520_v33 = vadd.f32 1.0, %v1641_v31 }
 0x542   :  { %1642 = vrcp.f32 %v610_v32  ;;  %v622_v46 = vand.u32 2147483648, %v610_v32  ;;  %vm616_vm3 = vweird.f32 %v610_v32  ;;  %v620_v47 = vand.u32 2147483647, %v610_v32 }
 0x543   :  { %1644 = vrcp.f32 %v520_v33  ;;  %v532_v52 = vand.u32 2147483648, %v520_v33  ;;  %vm526_vm8 = vweird.f32 %v520_v33  ;;  %v530_v57 = vand.u32 2147483647, %v520_v33 }
 0x544   :  { %v623_v53 = vor.u32 1.1754944e-38, %v622_v46  ;;  %vm621_vm9 = vcmp.eq.f32.partialorder %v620_v47, 8.507059e+37 }
 0x545   :  { %v533_v8 = vor.u32 1.1754944e-38, %v532_v52  ;;  %vm531_vm11 = vcmp.eq.f32.partialorder %v530_v57, 8.507059e+37 }
 0x548   :  { %v1643_v34 = vpop.eup %1642 }
 0x549   :  { %v1645_v35 = vpop.eup %1644  ;;  %v612_v36 = vmul.f32 %v1643_v34, %v610_v32  ;;  %vm617_vm2 = vweird.f32 %v1643_v34 }
 0x54a   :  { %v522_v38 = vmul.f32 %v1645_v35, %v520_v33  ;;  %vm618_vm4 = vmor %vm616_vm3, %vm617_vm2  ;;  %vm527_vm5 = vweird.f32 %v1645_v35 }
 0x54b   :  { %v613_v39 = vsub.f32 1.0, %v612_v36  ;;  %vm528_vm10 = vmor %vm526_vm8, %vm527_vm5 }
 0x54c   :  { %v523_v40 = vsub.f32 1.0, %v522_v38 }
 0x54d   :  { %v614_v41 = vmul.f32 %v1643_v34, %v613_v39 }
 0x54e   :  { %v524_v43 = vmul.f32 %v1645_v35, %v523_v40 }
 0x54f   :  { %v615_v44 = vadd.f32 %v1643_v34, %v614_v41 }
 0x550   :  { %v525_v48 = vadd.f32 %v1645_v35, %v524_v43 }
 0x551   :  { %v619_v49 = vsel %vm618_vm4, %v1643_v34, %v615_v44 }
 0x552   :  { %v624_v60 = vsel %vm621_vm9, %v623_v53, %v619_v49  ;;  %v529_v63 = vsel %vm528_vm10, %v1645_v35, %v525_v48 }
 0x553   :  { %v534_v37 = vsel %vm531_vm11, %v533_v8, %v529_v63  ;;  %v627_v16 = vmul.f32 %v624_v60, %v1987_v58 }
 0x554   :  { %v537_v2 = vmul.f32 %v534_v37, %v1990_v4 }
 0x5ae   :  { %v630_v61 = vpop.permute.xlu0 %629 }
 0x5af   :  { %v632_v5 = vmul.f32 %v630_v61, %v624_v60 }
 0x5b1   :  { %v540_v12 = vpop.permute.xlu1 %539  ;;  %634 = vrot.lane.b32.xlu2 %v632_v5, %s1826_s1 }
 0x5b2   :  { %v542_v15 = vmul.f32 %v540_v12, %v534_v37 }
 0x5b4   :  { %544 = vrot.lane.b32.xlu0 %v542_v15, %s1826_s1 }
 0x60b   :  { %v635_v17 = vpop.permute.xlu2 %634 }
 0x60c   :  { %v2026_v19 = vadd.f32 %v635_v17, %v627_v16 }
 0x60e   :  { %1646 = vtanh.f32 %v2026_v19 }
 0x614   :  { %v1647_v1 = vpop.eup %1646 }
 0x615   :  { %640 = vrot.lane.b32.xlu1 %v1647_v1, %s1825_s0 }
 0x626   :  { %v545_v20 = vpop.permute.xlu0 %544 }
 0x627   :  { %v2031_v21 = vadd.f32 %v545_v20, %v537_v2 }
 0x629   :  { %1648 = vtanh.f32 %v2031_v21 }
 0x62f   :  { %v1649_v22 = vpop.eup %1648 }
 0x630   :  { %550 = vrot.lane.b32.xlu2 %v1649_v22, %s1825_s0 }
 0x687   :  { %v641_v23 = vpop.permute.xlu1 %640 }
 0x688   :  { %v643_v58 = vmul.f32 %v641_v23, %v624_v60 }
 0x68a   :  { %645 = vrot.lane.b32.xlu0 %v643_v58, %s1826_s1  ;;  %v551_v24 = vpop.permute.xlu2 %550 }
 0x68b   :  { %v2036_v25 = vmul.f32 %v551_v24, %v534_v37 }
 0x68d   :  { %648 = vrot.lane.b32.xlu1 %v2036_v25, %s1825_s0 }
 0x6fc   :  { %v646_v26 = vpop.permute.xlu0 %645 }
 0x6fd   :  { %1574 = vmatmul.msk.f32.vlgmr.msrb.gmra.mxu3 %vm267_vm6, %v646_v26 }
 0x6fe   :  { %1072 = vmatpush.msrb.mxu3 %v1856_v6 }
 0x6ff   :  { %v649_v4 = vpop.permute.xlu1 %648 }
 0x700   :  { %v651_v27 = vsel %vm267_vm6, %v646_v26, %v649_v4  ;;  %1073 = vmatpush.msrb.mxu3 %v1859_v7 }
 0x701   :  { %1571 = vmatmul.msk.f32.vlgmr.msrb.gmra.mxu1 %vm335_vm7, %v651_v27 }
 0x702   :  { %1074 = vmatpush.msrb.mxu3 %v1866_v10  ;;  %1295 = vmatpush.msrb.mxu1 %v1887_v42 }
 0x704   :  { %1075 = vmatpush.msrb.mxu3 %v1869_v11  ;;  %1296 = vmatpush.msrb.mxu1 %v1895_v45 }
 0x706   :  { %1297 = vmatpush.msrb.mxu1 %v1903_v50 }
 0x708   :  { %1298 = vmatpush.msrb.mxu1 %v1908_v51 }
 0x70a   :  { %1299 = vmatpush.msrb.mxu1 %v1915_v54 }
 0x70c   :  { %1300 = vmatpush.msrb.mxu1 %v1922_v55 }
 0x70e   :  { %1301 = vmatpush.msrb.mxu1 %v1926_v56 }
 0x710   :  { %1302 = vmatpush.msrb.mxu1 %v1937_v59 }
 0x77e   :  { %v672_v28 = vpop.f32.mrf.mxu1 }
 0x77f   :  { %v673_v30 = vadd.f32 %v1979_v9, %v672_v28 }
 0x780   :  { %v761_v31 = vpop.f32.mrf.mxu3 }
 0x781   :  { %1650 = vtanh.f32 %v673_v30  ;;  %v764_v32 = vadd.f32 %v761_v31, %v162_v29  ;;  %v1572_v39 = vmul.f32 -1.442695, %v673_v30 }
 0x783   :  { %1652 = vtanh.f32 %v764_v32  ;;  %v1575_v35 = vmul.f32 -1.442695, %v764_v32 }
 0x785   :  { %1654 = vpow2.f32 %v1575_v35  ;;  %v187_v35 = vadd.f32 %v1875_v14, %v1873_v13 }
 0x787   :  { %v1651_v33 = vpop.eup %1650 }
 0x788   :  { %697 = vrot.lane.b32.xlu0 %v1651_v33, %s1825_s0 }
 0x789   :  { %v1653_v34 = vpop.eup %1652 }
 0x78a   :  { %787 = vrot.lane.b32.xlu2 %v1653_v34, %s1825_s0 }
 0x78b   :  { %v1655_v36 = vpop.eup %1654 }
 0x78c   :  { %v768_v38 = vadd.f32 1.0, %v1655_v36 }
 0x78e   :  { %1656 = vrcp.f32 %v768_v38  ;;  %v780_v48 = vand.u32 2147483648, %v768_v38  ;;  %vm774_vm13 = vweird.f32 %v768_v38  ;;  %v778_v49 = vand.u32 2147483647, %v768_v38 }
 0x78f   :  { %1658 = vpow2.f32 %v1572_v39 }
 0x790   :  { %v781_v53 = vor.u32 1.1754944e-38, %v780_v48  ;;  %vm779_vm15 = vcmp.eq.f32.partialorder %v778_v49, 8.507059e+37 }
 0x794   :  { %v1657_v40 = vpop.eup %1656 }
 0x795   :  { %v770_v62 = vmul.f32 %v1657_v40, %v768_v38  ;;  %v1659_v43 = vpop.eup %1658  ;;  %vm775_vm12 = vweird.f32 %v1657_v40 }
 0x796   :  { %v678_v44 = vadd.f32 1.0, %v1659_v43  ;;  %vm776_vm14 = vmor %vm774_vm13, %vm775_vm12 }
 0x797   :  { %v771_v41 = vsub.f32 1.0, %v770_v62 }
 0x798   :  { %1660 = vrcp.f32 %v678_v44  ;;  %v690_v15 = vand.u32 2147483648, %v678_v44  ;;  %vm684_vm3 = vweird.f32 %v678_v44  ;;  %v688_v16 = vand.u32 2147483647, %v678_v44 }
 0x799   :  { %v772_v46 = vmul.f32 %v1657_v40, %v771_v41 }
 0x79a   :  { %v691_v1 = vor.u32 1.1754944e-38, %v690_v15  ;;  %vm689_vm5 = vcmp.eq.f32.partialorder %v688_v16, 8.507059e+37 }
 0x79b   :  { %v773_v47 = vadd.f32 %v1657_v40, %v772_v46 }
 0x79d   :  { %v777_v52 = vsel %vm776_vm14, %v1657_v40, %v773_v47 }
 0x79e   :  { %v1661_v57 = vpop.eup %1660  ;;  %v782_v61 = vsel %vm779_vm15, %v781_v53, %v777_v52 }
 0x79f   :  { %v680_v5 = vmul.f32 %v1661_v57, %v678_v44  ;;  %vm685_vm2 = vweird.f32 %v1661_v57  ;;  %v785_v26 = vmul.f32 %v782_v61, %v2026_v19 }
 0x7a0   :  { %vm686_vm4 = vmor %vm684_vm3, %vm685_vm2 }
 0x7a1   :  { %v681_v8 = vsub.f32 1.0, %v680_v5 }
 0x7a3   :  { %v682_v12 = vmul.f32 %v1661_v57, %v681_v8 }
 0x7a5   :  { %v683_v37 = vadd.f32 %v1661_v57, %v682_v12 }
 0x7a7   :  { %v687_v17 = vsel %vm686_vm4, %v1661_v57, %v683_v37 }
 0x7a8   :  { %v692_v20 = vsel %vm689_vm5, %v691_v1, %v687_v17 }
 0x7a9   :  { %v695_v23 = vmul.f32 %v692_v20, %v2031_v21 }
 0x7e4   :  { %v788_v60 = vpop.permute.xlu2 %787 }
 0x7e5   :  { %v790_v63 = vmul.f32 %v788_v60, %v782_v61 }
 0x7e7   :  { %792 = vrot.lane.b32.xlu1 %v790_v63, %s1826_s1 }
 0x7fa   :  { %v698_v2 = vpop.permute.xlu0 %697 }
 0x7fb   :  { %v700_v22 = vmul.f32 %v698_v2, %v692_v20 }
 0x7fd   :  { %702 = vrot.lane.b32.xlu2 %v700_v22, %s1826_s1 }
 0x857   :  { %v703_v58 = vpop.permute.xlu2 %702 }
 0x858   :  { %v2063_v24 = vadd.f32 %v703_v58, %v695_v23 }
 0x859   :  { %v793_v4 = vpop.permute.xlu1 %792 }
 0x85a   :  { %1662 = vtanh.f32 %v2063_v24  ;;  %v2067_v27 = vadd.f32 %v793_v4, %v785_v26 }
 0x85c   :  { %1664 = vtanh.f32 %v2067_v27 }
 0x860   :  { %v1663_v28 = vpop.eup %1662 }
 0x861   :  { %708 = vrot.lane.b32.xlu1 %v1663_v28, %s1825_s0 }
 0x862   :  { %v1665_v29 = vpop.eup %1664 }
 0x863   :  { %798 = vrot.lane.b32.xlu0 %v1665_v29, %s1825_s0 }
 0x8d3   :  { %v709_v30 = vpop.permute.xlu1 %708 }
 0x8d4   :  { %v2072_v21 = vmul.f32 %v709_v30, %v692_v20 }
 0x8d5   :  { %v799_v31 = vpop.permute.xlu0 %798 }
 0x8d6   :  { %806 = vrot.lane.b32.xlu0 %v2072_v21, %s1825_s0  ;;  %v801_v19 = vmul.f32 %v799_v31, %v782_v61 }
 0x8d8   :  { %803 = vrot.lane.b32.xlu2 %v801_v19, %s1826_s1 }
 0x932   :  { %v804_v32 = vpop.permute.xlu2 %803 }
 0x933   :  { %1579 = vmatmul.msk.f32.vlgmr.msra.gmra.mxu3 %vm267_vm6, %v804_v32 }
 0x934   :  { %1230 = vmatpush.msra.mxu3 %v1856_v6 }
 0x936   :  { %1231 = vmatpush.msra.mxu3 %v1859_v7 }
 0x938   :  { %1232 = vmatpush.msra.mxu3 %v1866_v10 }
 0x93a   :  { %1233 = vmatpush.msra.mxu3 %v1869_v11 }
 0x948   :  { %v807_v33 = vpop.permute.xlu0 %806 }
 0x949   :  { %v809_v34 = vsel %vm267_vm6, %v804_v32, %v807_v33 }
 0x94a   :  { %1576 = vmatmul.msk.f32.vlgmr.msrb.gmra.mxu0 %vm335_vm7, %v809_v34 }
 0x94b   :  { %1453 = vmatpush.msrb.mxu0 %v1887_v42 }
 0x94d   :  { %1454 = vmatpush.msrb.mxu0 %v1895_v45 }
 0x94f   :  { %1455 = vmatpush.msrb.mxu0 %v1903_v50 }
 0x951   :  { %1456 = vmatpush.msrb.mxu0 %v1908_v51 }
 0x953   :  { %1457 = vmatpush.msrb.mxu0 %v1915_v54 }
 0x955   :  { %1458 = vmatpush.msrb.mxu0 %v1922_v55 }
 0x957   :  { %1459 = vmatpush.msrb.mxu0 %v1926_v56 }
 0x959   :  { %1460 = vmatpush.msrb.mxu0 %v1937_v59 }
 0x9b6   :  { %v919_v36 = vpop.f32.mrf.mxu3 }
 0x9b7   :  { %v922_v38 = vadd.f32 %v919_v36, %v187_v35  ;;  %v212_v36 = vadd.f32 %v1875_v14, %v1976_v3 }
 0x9b9   :  { %1666 = vtanh.f32 %v922_v38  ;;  %v1580_v55 = vmul.f32 -1.442695, %v922_v38 }
 0x9bf   :  { %v1667_v42 = vpop.eup %1666 }
 0x9c0   :  { %945 = vrot.lane.b32.xlu1 %v1667_v42, %s1825_s0 }
 0x9c7   :  { %v830_v45 = vpop.f32.mrf.mxu0 }
 0x9c8   :  { %v831_v50 = vadd.f32 %v1979_v9, %v830_v45 }
 0x9ca   :  { %1668 = vtanh.f32 %v831_v50  ;;  %v1577_v54 = vmul.f32 -1.442695, %v831_v50 }
 0x9cc   :  { %1670 = vpow2.f32 %v1577_v54 }
 0x9cd   :  { %1672 = vpow2.f32 %v1580_v55 }
 0x9d0   :  { %v1669_v51 = vpop.eup %1668 }
 0x9d1   :  { %855 = vrot.lane.b32.xlu2 %v1669_v51, %s1825_s0 }
 0x9d2   :  { %v1671_v56 = vpop.eup %1670 }
 0x9d3   :  { %v836_v59 = vadd.f32 1.0, %v1671_v56  ;;  %v1673_v13 = vpop.eup %1672 }
 0x9d4   :  { %v926_v39 = vadd.f32 1.0, %v1673_v13 }
 0x9d5   :  { %1674 = vrcp.f32 %v836_v59  ;;  %v848_v49 = vand.u32 2147483648, %v836_v59  ;;  %vm842_vm9 = vweird.f32 %v836_v59  ;;  %v846_v52 = vand.u32 2147483647, %v836_v59 }
 0x9d6   :  { %1676 = vrcp.f32 %v926_v39  ;;  %v938_v12 = vand.u32 2147483648, %v926_v39  ;;  %vm932_vm13 = vweird.f32 %v926_v39  ;;  %v936_v37 = vand.u32 2147483647, %v926_v39 }
 0x9d7   :  { %v849_v60 = vor.u32 1.1754944e-38, %v848_v49  ;;  %vm847_vm11 = vcmp.eq.f32.partialorder %v846_v52, 8.507059e+37 }
 0x9d8   :  { %v939_v16 = vor.u32 1.1754944e-38, %v938_v12  ;;  %vm937_vm15 = vcmp.eq.f32.partialorder %v936_v37, 8.507059e+37 }
 0x9db   :  { %v1675_v40 = vpop.eup %1674 }
 0x9dc   :  { %v838_v62 = vmul.f32 %v1675_v40, %v836_v59  ;;  %v1677_v43 = vpop.eup %1676  ;;  %vm843_vm8 = vweird.f32 %v1675_v40 }
 0x9dd   :  { %v928_v46 = vmul.f32 %v1677_v43, %v926_v39  ;;  %vm844_vm10 = vmor %vm842_vm9, %vm843_vm8  ;;  %vm933_vm12 = vweird.f32 %v1677_v43 }
 0x9de   :  { %v839_v41 = vsub.f32 1.0, %v838_v62  ;;  %vm934_vm14 = vmor %vm932_vm13, %vm933_vm12 }
 0x9df   :  { %v929_v48 = vsub.f32 1.0, %v928_v46 }
 0x9e0   :  { %v840_v44 = vmul.f32 %v1675_v40, %v839_v41 }
 0x9e1   :  { %v930_v57 = vmul.f32 %v1677_v43, %v929_v48 }
 0x9e2   :  { %v841_v47 = vadd.f32 %v1675_v40, %v840_v44 }
 0x9e3   :  { %v931_v8 = vadd.f32 %v1677_v43, %v930_v57 }
 0x9e4   :  { %v845_v53 = vsel %vm844_vm10, %v1675_v40, %v841_v47 }
 0x9e5   :  { %v850_v63 = vsel %vm847_vm11, %v849_v60, %v845_v53  ;;  %v935_v15 = vsel %vm934_vm14, %v1677_v43, %v931_v8 }
 0x9e6   :  { %v940_v17 = vsel %vm937_vm15, %v939_v16, %v935_v15  ;;  %v853_v20 = vmul.f32 %v850_v63, %v2063_v24 }
 0x9e7   :  { %v943_v58 = vmul.f32 %v940_v17, %v2067_v27 }
 0xa2b   :  { %v856_v61 = vpop.permute.xlu2 %855 }
 0xa2c   :  { %v858_v5 = vmul.f32 %v856_v61, %v850_v63 }
 0xa2e   :  { %860 = vrot.lane.b32.xlu1 %v858_v5, %s1826_s1 }
 0xa32   :  { %v946_v1 = vpop.permute.xlu1 %945 }
 0xa33   :  { %v948_v2 = vmul.f32 %v946_v1, %v940_v17 }
 0xa35   :  { %950 = vrot.lane.b32.xlu0 %v948_v2, %s1826_s1 }
 0xaa0   :  { %v861_v22 = vpop.permute.xlu1 %860 }
 0xaa1   :  { %v2100_v23 = vadd.f32 %v861_v22, %v853_v20 }
 0xaa3   :  { %1678 = vtanh.f32 %v2100_v23 }
 0xaa7   :  { %v951_v26 = vpop.permute.xlu0 %950 }
 0xaa8   :  { %v2104_v28 = vadd.f32 %v951_v26, %v943_v58 }
 0xaa9   :  { %v1679_v4 = vpop.eup %1678 }
 0xaaa   :  { %866 = vrot.lane.b32.xlu0 %v1679_v4, %s1825_s0  ;;  %1680 = vtanh.f32 %v2104_v28 }
 0xab0   :  { %v1681_v29 = vpop.eup %1680 }
 0xab1   :  { %956 = vrot.lane.b32.xlu2 %v1681_v29, %s1825_s0  ;;  %v1739_v29 = vld [vmem:[#allocation2 + $0x8] sm:$0xff] }
 0xb0b   :  { %v957_v30 = vpop.permute.xlu2 %956 }
 0xb0c   :  { %v959_v24 = vmul.f32 %v957_v30, %v940_v17  ;;  %v215_v30 = vrot.slane %v1739_v29, 5 }
 0xb0e   :  { %961 = vrot.lane.b32.xlu1 %v959_v24, %s1826_s1 }
 0xb1c   :  { %v867_v31 = vpop.permute.xlu0 %866 }
 0xb1d   :  { %v2110_v19 = vmul.f32 %v867_v31, %v850_v63 }
 0xb1f   :  { %964 = vrot.lane.b32.xlu2 %v2110_v19, %s1825_s0 }
 0xb79   :  { %v965_v27 = vpop.permute.xlu2 %964 }
 0xb80   :  { %v962_v32 = vpop.permute.xlu1 %961 }
 0xb81   :  { %v967_v33 = vsel %vm267_vm6, %v962_v32, %v965_v27  ;;  %1584 = vmatmul.msk.f32.vlgmr.msrb.gmra.mxu3 %vm267_vm6, %v962_v32 }
 0xb82   :  { %1581 = vmatmul.msk.f32.vlgmr.msra.gmra.mxu1 %vm335_vm7, %v967_v33  ;;  %1388 = vmatpush.msrb.mxu3 %v1856_v6 }
 0xb84   :  { %1389 = vmatpush.msrb.mxu3 %v1859_v7 }
 0xb86   :  { %1390 = vmatpush.msrb.mxu3 %v1866_v10 }
 0xb88   :  { %1391 = vmatpush.msrb.mxu3 %v1869_v11 }
 0xbff   :  { %v988_v34 = vpop.f32.mrf.mxu1 }
 0xc00   :  { %v989_v35 = vadd.f32 %v1979_v9, %v988_v34 }
 0xc02   :  { %1682 = vtanh.f32 %v989_v35  ;;  %v1582_v7 = vmul.f32 -1.442695, %v989_v35 }
 0xc04   :  { %v1077_v38 = vpop.f32.mrf.mxu3 }
 0xc05   :  { %v1080_v42 = vadd.f32 %v1077_v38, %v212_v36  ;;  %v2149_v36 = vld [vmem:[#allocation5 + $0x28] ss:$0 sm:$0xff] }
 0xc07   :  { %1684 = vtanh.f32 %v1080_v42  ;;  %v1585_v10 = vmul.f32 -1.442695, %v1080_v42 }
 0xc08   :  { %v1683_v45 = vpop.eup %1682  ;;  %1686 = vpow2.f32 %v1582_v7 }
 0xc09   :  { %1013 = vrot.lane.b32.xlu1 %v1683_v45, %s1825_s0  ;;  %1688 = vpow2.f32 %v1585_v10 }
 0xc0d   :  { %v1685_v6 = vpop.eup %1684 }
 0xc0e   :  { %1103 = vrot.lane.b32.xlu0 %v1685_v6, %s1825_s0  ;;  %v1687_v11 = vpop.eup %1686 }
 0xc0f   :  { %v994_v50 = vadd.f32 1.0, %v1687_v11  ;;  %v1689_v51 = vpop.eup %1688 }
 0xc10   :  { %v1084_v54 = vadd.f32 1.0, %v1689_v51 }
 0xc11   :  { %1690 = vrcp.f32 %v994_v50  ;;  %v1006_v62 = vand.u32 2147483648, %v994_v50  ;;  %vm1000_vm3 = vweird.f32 %v994_v50  ;;  %v1004_v43 = vand.u32 2147483647, %v994_v50 }
 0xc12   :  { %1692 = vrcp.f32 %v1084_v54  ;;  %v1096_v48 = vand.u32 2147483648, %v1084_v54  ;;  %vm1090_vm9 = vweird.f32 %v1084_v54  ;;  %v1094_v53 = vand.u32 2147483647, %v1084_v54 }
 0xc13   :  { %v1007_v46 = vor.u32 1.1754944e-38, %v1006_v62  ;;  %vm1005_vm8 = vcmp.eq.f32.partialorder %v1004_v43, 8.507059e+37 }
 0xc14   :  { %v1097_v61 = vor.u32 1.1754944e-38, %v1096_v48  ;;  %vm1095_vm11 = vcmp.eq.f32.partialorder %v1094_v53, 8.507059e+37 }
 0xc17   :  { %v1691_v14 = vpop.eup %1690 }
 0xc18   :  { %v996_v3 = vmul.f32 %v1691_v14, %v994_v50  ;;  %v1693_v55 = vpop.eup %1692  ;;  %vm1001_vm2 = vweird.f32 %v1691_v14 }
 0xc19   :  { %v1086_v59 = vmul.f32 %v1693_v55, %v1084_v54  ;;  %vm1002_vm4 = vmor %vm1000_vm3, %vm1001_vm2  ;;  %vm1091_vm5 = vweird.f32 %v1693_v55 }
 0xc1a   :  { %v997_v56 = vsub.f32 1.0, %v996_v3  ;;  %vm1092_vm10 = vmor %vm1090_vm9, %vm1091_vm5 }
 0xc1b   :  { %v1087_v39 = vsub.f32 1.0, %v1086_v59 }
 0xc1c   :  { %v998_v13 = vmul.f32 %v1691_v14, %v997_v56 }
 0xc1d   :  { %v1088_v41 = vmul.f32 %v1693_v55, %v1087_v39 }
 0xc1e   :  { %v999_v40 = vadd.f32 %v1691_v14, %v998_v13 }
 0xc1f   :  { %v1089_v47 = vadd.f32 %v1693_v55, %v1088_v41 }
 0xc20   :  { %v1003_v44 = vsel %vm1002_vm4, %v1691_v14, %v999_v40 }
 0xc21   :  { %v1008_v52 = vsel %vm1005_vm8, %v1007_v46, %v1003_v44  ;;  %v1093_v60 = vsel %vm1092_vm10, %v1693_v55, %v1089_v47 }
 0xc22   :  { %v1098_v5 = vsel %vm1095_vm11, %v1097_v61, %v1093_v60  ;;  %v1011_v17 = vmul.f32 %v1008_v52, %v2100_v23 }
 0xc23   :  { %v1101_v12 = vmul.f32 %v1098_v5, %v2104_v28  ;;  %v1738_v28 = vld [vmem:[#allocation2] sm:$0xff] }
 0xc24   :  { %v214_v23 = vrot.slane %v1738_v28, 6 }
 0xc26   :  { %v216_v24 = vsel %vm65_vm0, %v215_v30, %v214_v23 }
 0xc27   :  { %1558 = vmatmul.msk.f32.vlgmr.msrb.gmra.mxu2 %vm67_vm1, %v216_v24  ;;  %v262_v24 = vadd.f32 %v2149_v36, %v1974_v0 }
 0xc7b   :  { %v1014_v49 = vpop.permute.xlu1 %1013 }
 0xc7c   :  { %v1016_v57 = vmul.f32 %v1014_v49, %v1008_v52 }
 0xc7e   :  { %1018 = vrot.lane.b32.xlu0 %v1016_v57, %s1826_s1 }
 0xc80   :  { %v1104_v63 = vpop.permute.xlu0 %1103 }
 0xc81   :  { %v1106_v8 = vmul.f32 %v1104_v63, %v1098_v5 }
 0xc83   :  { %1108 = vrot.lane.b32.xlu2 %v1106_v8, %s1826_s1 }
 0xcaa   :  { %v236_v33 = vpop.f32.mrf.mxu2 }
 0xcab   :  { %v237_v38 = vadd.f32 %v2149_v36, %v236_v33 }
 0xcdd   :  { %v1109_v37 = vpop.permute.xlu2 %1108 }
 0xcde   :  { %v2129_v15 = vadd.f32 %v1109_v37, %v1101_v12 }
 0xce0   :  { %1694 = vtanh.f32 %v2129_v15 }
 0xce6   :  { %v1695_v16 = vpop.eup %1694 }
 0xce7   :  { %1114 = vrot.lane.b32.xlu1 %v1695_v16, %s1825_s0 }
 0xcf0   :  { %v1019_v1 = vpop.permute.xlu0 %1018 }
 0xcf1   :  { %v2134_v2 = vadd.f32 %v1019_v1, %v1011_v17 }
 0xcf3   :  { %1696 = vtanh.f32 %v2134_v2 }
 0xcf9   :  { %v1697_v20 = vpop.eup %1696 }
 0xcfa   :  { %1024 = vrot.lane.b32.xlu2 %v1697_v20, %s1825_s0 }
 0xd54   :  { %v1025_v22 = vpop.permute.xlu2 %1024 }
 0xd55   :  { %v2138_v58 = vmul.f32 %v1025_v22, %v1008_v52 }
 0xd57   :  { %1122 = vrot.lane.b32.xlu1 %v2138_v58, %s1825_s0 }
 0xd59   :  { %v1115_v26 = vpop.permute.xlu1 %1114 }
 0xd5a   :  { %v1117_v4 = vmul.f32 %v1115_v26, %v1098_v5 }
 0xd5c   :  { %1119 = vrot.lane.b32.xlu0 %v1117_v4, %s1826_s1 }
 0xdc9   :  { %v1123_v31 = vpop.permute.xlu1 %1122 }
 0xdce   :  { %v1120_v27 = vpop.permute.xlu0 %1119 }
 0xdcf   :  { %v1125_v32 = vsel %vm267_vm6, %v1120_v27, %v1123_v31  ;;  %1589 = vmatmul.msk.f32.vlgmr.msra.gmra.mxu3 %vm267_vm6, %v1120_v27 }
 0xdd0   :  { %1586 = vmatmul.msk.f32.vlgmr.msra.gmra.mxu0 %vm335_vm7, %v1125_v32 }
 0xe4d   :  { %v1146_v34 = vpop.f32.mrf.mxu0 }
 0xe4e   :  { %v1147_v35 = vadd.f32 %v1979_v9, %v1146_v34  ;;  %v2177_v34 = vld [vmem:[#allocation5 + $0x70] ss:$0 sm:$0xff] }
 0xe50   :  { %1698 = vtanh.f32 %v1147_v35  ;;  %v1587_v9 = vmul.f32 -1.442695, %v1147_v35 }
 0xe52   :  { %v1235_v42 = vpop.f32.mrf.mxu3 }
 0xe53   :  { %v1238_v45 = vadd.f32 %v1235_v42, %v237_v38 }
 0xe55   :  { %1700 = vtanh.f32 %v1238_v45  ;;  %v1590_v10 = vmul.f32 -1.442695, %v1238_v45 }
 0xe56   :  { %v1699_v6 = vpop.eup %1698 }
 0xe57   :  { %1171 = vrot.lane.b32.xlu0 %v1699_v6, %s1825_s0  ;;  %1702 = vpow2.f32 %v1590_v10 }
 0xe5b   :  { %v1701_v7 = vpop.eup %1700 }
 0xe5c   :  { %1261 = vrot.lane.b32.xlu2 %v1701_v7, %s1825_s0 }
 0xe5d   :  { %v1703_v11 = vpop.eup %1702 }
 0xe5e   :  { %v1242_v50 = vadd.f32 1.0, %v1703_v11 }
 0xe60   :  { %1704 = vrcp.f32 %v1242_v50  ;;  %v1254_v13 = vand.u32 2147483648, %v1242_v50  ;;  %vm1248_vm1 = vweird.f32 %v1242_v50  ;;  %v1252_v39 = vand.u32 2147483647, %v1242_v50 }
 0xe61   :  { %1706 = vpow2.f32 %v1587_v9 }
 0xe62   :  { %v1255_v41 = vor.u32 1.1754944e-38, %v1254_v13  ;;  %vm1253_vm13 = vcmp.eq.f32.partialorder %v1252_v39, 8.507059e+37 }
 0xe66   :  { %v1705_v51 = vpop.eup %1704 }
 0xe67   :  { %v1244_v54 = vmul.f32 %v1705_v51, %v1242_v50  ;;  %v1707_v14 = vpop.eup %1706  ;;  %vm1249_vm0 = vweird.f32 %v1705_v51 }
 0xe68   :  { %v1152_v55 = vadd.f32 1.0, %v1707_v14  ;;  %vm1250_vm12 = vmor %vm1248_vm1, %vm1249_vm0 }
 0xe69   :  { %v1245_v3 = vsub.f32 1.0, %v1244_v54 }
 0xe6a   :  { %1708 = vrcp.f32 %v1152_v55  ;;  %v1164_v53 = vand.u32 2147483648, %v1152_v55  ;;  %vm1158_vm15 = vweird.f32 %v1152_v55  ;;  %v1162_v57 = vand.u32 2147483647, %v1152_v55 }
 0xe6b   :  { %v1246_v56 = vmul.f32 %v1705_v51, %v1245_v3 }
 0xe6c   :  { %v1165_v61 = vor.u32 1.1754944e-38, %v1164_v53  ;;  %vm1163_vm3 = vcmp.eq.f32.partialorder %v1162_v57, 8.507059e+37 }
 0xe6d   :  { %v1247_v59 = vadd.f32 %v1705_v51, %v1246_v56 }
 0xe6f   :  { %v1251_v62 = vsel %vm1250_vm12, %v1705_v51, %v1247_v59 }
 0xe70   :  { %v1709_v40 = vpop.eup %1708  ;;  %v1256_v43 = vsel %vm1253_vm13, %v1255_v41, %v1251_v62 }
 0xe71   :  { %v1154_v46 = vmul.f32 %v1709_v40, %v1152_v55  ;;  %vm1159_vm14 = vweird.f32 %v1709_v40  ;;  %v1259_v17 = vmul.f32 %v1256_v43, %v2129_v15 }
 0xe72   :  { %vm1160_vm2 = vmor %vm1158_vm15, %vm1159_vm14 }
 0xe73   :  { %v1155_v48 = vsub.f32 1.0, %v1154_v46 }
 0xe75   :  { %v1156_v49 = vmul.f32 %v1709_v40, %v1155_v48 }
 0xe77   :  { %v1157_v52 = vadd.f32 %v1709_v40, %v1156_v49 }
 0xe79   :  { %v1161_v60 = vsel %vm1160_vm2, %v1709_v40, %v1157_v52 }
 0xe7a   :  { %v1166_v5 = vsel %vm1163_vm3, %v1165_v61, %v1161_v60 }
 0xe7b   :  { %v1169_v12 = vmul.f32 %v1166_v5, %v2134_v2 }
 0xeb6   :  { %v1262_v44 = vpop.permute.xlu2 %1261 }
 0xeb7   :  { %v1264_v47 = vmul.f32 %v1262_v44, %v1256_v43 }
 0xeb9   :  { %1266 = vrot.lane.b32.xlu1 %v1264_v47, %s1826_s1 }
 0xec9   :  { %v1172_v63 = vpop.permute.xlu0 %1171 }
 0xeca   :  { %v1174_v8 = vmul.f32 %v1172_v63, %v1166_v5 }
 0xecc   :  { %1176 = vrot.lane.b32.xlu2 %v1174_v8, %s1826_s1 }
 0xf26   :  { %v1177_v37 = vpop.permute.xlu2 %1176 }
 0xf27   :  { %v2157_v16 = vadd.f32 %v1177_v37, %v1169_v12 }
 0xf29   :  { %1710 = vtanh.f32 %v2157_v16 }
 0xf2b   :  { %v1267_v1 = vpop.permute.xlu1 %1266 }
 0xf2c   :  { %v2161_v20 = vadd.f32 %v1267_v1, %v1259_v17 }
 0xf2e   :  { %1712 = vtanh.f32 %v2161_v20 }
 0xf2f   :  { %v1711_v22 = vpop.eup %1710 }
 0xf30   :  { %1182 = vrot.lane.b32.xlu1 %v1711_v22, %s1825_s0 }
 0xf34   :  { %v1713_v26 = vpop.eup %1712 }
 0xf35   :  { %1272 = vrot.lane.b32.xlu0 %v1713_v26, %s1825_s0  ;;  %v398_v26 = vld [vmem:[#allocation5 + $0x88] sm:$0xff] }
 0xfa2   :  { %v1183_v4 = vpop.permute.xlu1 %1182 }
 0xfa3   :  { %v2166_v2 = vmul.f32 %v1183_v4, %v1166_v5  ;;  %v397_v4 = vld [vmem:[#allocation5 + $0x80] sm:$0xff] }
 0xfa5   :  { %1280 = vrot.lane.b32.xlu0 %v2166_v2, %s1825_s0 }
 0xfa7   :  { %v1273_v28 = vpop.permute.xlu0 %1272 }
 0xfa8   :  { %v1275_v23 = vmul.f32 %v1273_v28, %v1256_v43  ;;  %v396_v28 = vld [vmem:[#allocation5 + $0x78] sm:$0xff] }
 0xfaa   :  { %1277 = vrot.lane.b32.xlu2 %v1275_v23, %s1826_s1 }
0x1004   :  { %v1278_v15 = vpop.permute.xlu2 %1277 }
0x1005   :  { %1594 = vmatmul.msk.f32.vlgmr.msrb.gmra.mxu3 %vm267_vm6, %v1278_v15 }
0x1017   :  { %v1281_v29 = vpop.permute.xlu0 %1280 }
0x1018   :  { %v1283_v30 = vsel %vm267_vm6, %v1278_v15, %v1281_v29 }
0x1019   :  { %1591 = vmatmul.msk.f32.vlgmr.msrb.gmra.mxu1 %vm335_vm7, %v1283_v30 }
0x1088   :  { %v1393_v31 = vpop.f32.mrf.mxu3 }
0x1089   :  { %v1396_v27 = vadd.f32 %v1393_v31, %v262_v24 }
0x108b   :  { %1714 = vtanh.f32 %v1396_v27  ;;  %v1595_v42 = vmul.f32 -1.442695, %v1396_v27 }
0x1091   :  { %v1715_v32 = vpop.eup %1714 }
0x1092   :  { %1419 = vrot.lane.b32.xlu2 %v1715_v32, %s1825_s0  ;;  %v557_v32 = vld [vmem:[#allocation5 + $0xb0] sm:$0xff] }
0x1096   :  { %v1304_v33 = vpop.f32.mrf.mxu1 }
0x1097   :  { %v1305_v35 = vadd.f32 %v2177_v34, %v1304_v33  ;;  %v556_v33 = vld [vmem:[#allocation5 + $0xa8] sm:$0xff] }
0x1099   :  { %1716 = vtanh.f32 %v1305_v35  ;;  %v1592_v11 = vmul.f32 -1.442695, %v1305_v35  ;;  %v554_v35 = vld [vmem:[#allocation5 + $0x98] sm:$0xff] }
0x109a   :  { %1718 = vpow2.f32 %v1595_v42 }
0x109f   :  { %v1717_v38 = vpop.eup %1716 }
0x10a0   :  { %1329 = vrot.lane.b32.xlu1 %v1717_v38, %s1825_s0  ;;  %v1719_v45 = vpop.eup %1718  ;;  %v715_v38 = vld [vmem:[#allocation5 + $0xd0] sm:$0xff] }
0x10a1   :  { %v1400_v6 = vadd.f32 1.0, %v1719_v45 }
0x10a3   :  { %1720 = vrcp.f32 %v1400_v6  ;;  %v1412_v9 = vand.u32 2147483648, %v1400_v6  ;;  %vm1406_vm5 = vweird.f32 %v1400_v6  ;;  %v1410_v51 = vand.u32 2147483647, %v1400_v6 }
0x10a4   :  { %1722 = vpow2.f32 %v1592_v11 }
0x10a5   :  { %v1413_v14 = vor.u32 1.1754944e-38, %v1412_v9  ;;  %vm1411_vm9 = vcmp.eq.f32.partialorder %v1410_v51, 8.507059e+37 }
0x10a9   :  { %v1721_v0 = vpop.eup %1720 }
0x10aa   :  { %v1402_v36 = vmul.f32 %v1721_v0, %v1400_v6  ;;  %vm1407_vm4 = vweird.f32 %v1721_v0  ;;  %v1723_v59 = vpop.eup %1722  ;;  %v712_v6 = vld [vmem:[#allocation5 + $0xb8] sm:$0xff] }
0x10ab   :  { %vm1408_vm8 = vmor %vm1406_vm5, %vm1407_vm4  ;;  %v1310_v13 = vadd.f32 1.0, %v1723_v59  ;;  %v871_v59 = vld [vmem:[#allocation5 + $0xe0] sm:$0xff] }
0x10ac   :  { %v1403_v7 = vsub.f32 1.0, %v1402_v36 }
0x10ad   :  { %1724 = vrcp.f32 %v1310_v13  ;;  %v1322_v44 = vand.u32 2147483648, %v1310_v13  ;;  %vm1316_vm11 = vweird.f32 %v1310_v13  ;;  %v1320_v46 = vand.u32 2147483647, %v1310_v13 }
0x10ae   :  { %v1404_v10 = vmul.f32 %v1721_v0, %v1403_v7 }
0x10af   :  { %v1323_v48 = vor.u32 1.1754944e-38, %v1322_v44  ;;  %vm1321_vm1 = vcmp.eq.f32.partialorder %v1320_v46, 8.507059e+37  ;;  %v1031_v46 = vld [vmem:[#allocation5 + $0x110] sm:$0xff] }
0x10b0   :  { %v1405_v50 = vadd.f32 %v1721_v0, %v1404_v10 }
0x10b2   :  { %v1409_v54 = vsel %vm1408_vm8, %v1721_v0, %v1405_v50 }
0x10b3   :  { %v1414_v55 = vsel %vm1411_vm9, %v1413_v14, %v1409_v54  ;;  %v1725_v39 = vpop.eup %1724 }
0x10b4   :  { %v1312_v40 = vmul.f32 %v1725_v39, %v1310_v13  ;;  %vm1317_vm10 = vweird.f32 %v1725_v39  ;;  %v1417_v57 = vmul.f32 %v1414_v55, %v2161_v20  ;;  %v870_v13 = vld [vmem:[#allocation5 + $0xd8] sm:$0xff] }
0x10b5   :  { %vm1318_vm0 = vmor %vm1316_vm11, %vm1317_vm10 }
0x10b6   :  { %v1313_v62 = vsub.f32 1.0, %v1312_v40 }
0x10b8   :  { %v1314_v41 = vmul.f32 %v1725_v39, %v1313_v62 }
0x10ba   :  { %v1315_v43 = vadd.f32 %v1725_v39, %v1314_v41 }
0x10bc   :  { %v1319_v47 = vsel %vm1318_vm0, %v1725_v39, %v1315_v43 }
0x10bd   :  { %v1324_v52 = vsel %vm1321_vm1, %v1323_v48, %v1319_v47  ;;  %v1030_v47 = vld [vmem:[#allocation5 + $0x108] sm:$0xff]  ;;  %v1029_v48 = vld [vmem:[#allocation5 + $0x100] sm:$0xff] }
0x10be   :  { %v1327_v5 = vmul.f32 %v1324_v52, %v2157_v16  ;;  %v399_v16 = vld [vmem:[#allocation5 + $0x90] sm:$0xff] }
0x10bf   :  { %417 = vmatpush.msra.mxu2 %v399_v16  ;;  %v1502_v16 = vld [vmem:[#allocation5 + $0x158] sm:$0xff] }
0x10c1   :  { %418 = vmatpush.msra.mxu2 %v398_v26 }
0x10c3   :  { %419 = vmatpush.msra.mxu2 %v397_v4 }
0x10c5   :  { %420 = vmatpush.msra.mxu2 %v396_v28 }
0x10c7   :  { %575 = vmatpush.msrb.mxu2 %v557_v32 }
0x10c9   :  { %576 = vmatpush.msrb.mxu2 %v556_v33 }
0x10ec   :  { %v1420_v3 = vpop.permute.xlu2 %1419 }
0x10ed   :  { %v1422_v56 = vmul.f32 %v1420_v3, %v1414_v55  ;;  %v873_v3 = vld [vmem:[#allocation5 + $0xf0] sm:$0xff] }
0x10ef   :  { %1424 = vrot.lane.b32.xlu1 %v1422_v56, %s1826_s1  ;;  %v872_v56 = vld [vmem:[#allocation5 + $0xe8] sm:$0xff] }
0x1112   :  { %v1330_v49 = vpop.permute.xlu1 %1329 }
0x1113   :  { %v1332_v53 = vmul.f32 %v1330_v49, %v1324_v52  ;;  %v1028_v49 = vld [vmem:[#allocation5 + $0xf8] sm:$0xff] }
0x1115   :  { %1334 = vrot.lane.b32.xlu0 %v1332_v53, %s1826_s1  ;;  %v1188_v53 = vld [vmem:[#allocation5 + $0x128] sm:$0xff] }
0x1161   :  { %v1425_v60 = vpop.permute.xlu1 %1424 }
0x1162   :  { %v1427_v61 = vadd.f32 %v1425_v60, %v1417_v57  ;;  %v1187_v57 = vld [vmem:[#allocation5 + $0x120] sm:$0xff]  ;;  %v1186_v60 = vld [vmem:[#allocation5 + $0x118] sm:$0xff] }
0x1164   :  { %1726 = vtanh.f32 %v1427_v61 }
0x116a   :  { %v1727_v63 = vpop.eup %1726 }
0x116b   :  { %1430 = vrot.lane.b32.xlu0 %v1727_v63, %s1825_s0 }
0x1187   :  { %v1335_v8 = vpop.permute.xlu0 %1334 }
0x1188   :  { %v2186_v12 = vadd.f32 %v1335_v8, %v1327_v5  ;;  %v1346_v8 = vld [vmem:[#allocation5 + $0x148] sm:$0xff] }
0x118a   :  { %1728 = vtanh.f32 %v2186_v12 }
0x1190   :  { %v1729_v37 = vpop.eup %1728 }
0x1191   :  { %1340 = vrot.lane.b32.xlu2 %v1729_v37, %s1825_s0  ;;  %v1344_v37 = vld [vmem:[#allocation5 + $0x138] sm:$0xff] }
0x11dd   :  { %v1431_v17 = vpop.permute.xlu0 %1430 }
0x11de   :  { %v1433_v1 = vmul.f32 %v1431_v17, %v1414_v55  ;;  %v1505_v17 = vld [vmem:[#allocation5 + $0x170] sm:$0xff] }
0x11e0   :  { %1435 = vrot.lane.b32.xlu1 %v1433_v1, %s1826_s1 }
0x11eb   :  { %v1341_v20 = vpop.permute.xlu2 %1340 }
0x11ec   :  { %v1343_v22 = vmul.f32 %v1341_v20, %v1324_v52  ;;  %v1189_v52 = vld [vmem:[#allocation5 + $0x130] sm:$0xff]  ;;  %v1504_v20 = vld [vmem:[#allocation5 + $0x168] sm:$0xff] }
0x11ee   :  { %1438 = vrot.lane.b32.xlu2 %v1343_v22, %s1825_s0 }
0x11f6   :  { %401 = vrot.lane.b32.xlu2 %v2000_v18, %s1826_s1 }
0x11fe   :  { %717 = vrot.lane.b32.xlu2 %v2072_v21, %s1826_s1 }
0x1206   :  { %1191 = vrot.lane.b32.xlu2 %v2166_v2, %s1826_s1 }
0x1248   :  { %v1439_v23 = vpop.permute.xlu2 %1438 }
0x1250   :  { %v402_v15 = vpop.permute.xlu2 %401 }
0x1251   :  { %1563 = vmatmul.msk.f32.vlgmr.msra.gmra.mxu2 %vm267_vm6, %v402_v15 }
0x1252   :  { %v1436_v29 = vpop.permute.xlu1 %1435 }
0x1253   :  { %v1441_v18 = vsel %vm267_vm6, %v1436_v29, %v1439_v23 }
0x1254   :  { %1596 = vmatmul.msk.f32.vlgmr.msrb.gmra.mxu0 %vm335_vm7, %v1441_v18 }
0x1258   :  { %v718_v39 = vpop.permute.xlu2 %717 }
0x1260   :  { %v1192_v1 = vpop.permute.xlu2 %1191 }
0x12d1   :  { %v1462_v21 = vpop.f32.mrf.mxu0 }
0x12d2   :  { %v1463_v2 = vadd.f32 %v2177_v34, %v1462_v21  ;;  %v555_v34 = vld [vmem:[#allocation5 + $0xa0] sm:$0xff] }
0x12d3   :  { %577 = vmatpush.msrb.mxu2 %v555_v34 }
0x12d4   :  { %1730 = vtanh.f32 %v1463_v2  ;;  %v1597_v24 = vmul.f32 -1.442695, %v1463_v2  ;;  %v422_v28 = vpop.f32.mrf.mxu2  ;;  %v1609_v2 = vld [vmem:[#allocation5 + $0x178] ss:$0 sm:$0xff] }
0x12d5   :  { %578 = vmatpush.msrb.mxu2 %v554_v35 }
0x12d6   :  { %1732 = vpow2.f32 %v1597_v24 }
0x12d7   :  { %733 = vmatpush.msra.mxu2 %v715_v38 }
0x12da   :  { %v1731_v30 = vpop.eup %1730 }
0x12db   :  { %1487 = vrot.lane.b32.xlu0 %v1731_v30, %s1825_s0  ;;  %v425_v30 = vadd.f32 %v1609_v2, %v422_v28 }
0x12dc   :  { %v1733_v31 = vpop.eup %1732 }
0x12dd   :  { %v1468_v27 = vadd.f32 1.0, %v1733_v31 }
0x12df   :  { %1734 = vrcp.f32 %v1468_v27  ;;  %v1480_v10 = vand.u32 2147483648, %v1468_v27  ;;  %vm1474_vm12 = vweird.f32 %v1468_v27  ;;  %v1478_v11 = vand.u32 2147483647, %v1468_v27 }
0x12e1   :  { %v1481_v9 = vor.u32 1.1754944e-38, %v1480_v10  ;;  %vm1479_vm14 = vcmp.eq.f32.partialorder %v1478_v11, 8.507059e+37 }
0x12e3   :  { %559 = vrot.lane.b32.xlu0 %v2036_v25, %s1826_s1  ;;  %v714_v25 = vld [vmem:[#allocation5 + $0xc8] sm:$0xff] }
0x12e4   :  { %734 = vmatpush.msra.mxu2 %v714_v25 }
0x12e5   :  { %v1735_v42 = vpop.eup %1734 }
0x12e6   :  { %v1470_v45 = vmul.f32 %v1735_v42, %v1468_v27  ;;  %vm1475_vm7 = vweird.f32 %v1735_v42 }
0x12e7   :  { %vm1476_vm13 = vmor %vm1474_vm12, %vm1475_vm7 }
0x12e8   :  { %v1471_v0 = vsub.f32 1.0, %v1470_v45 }
0x12ea   :  { %v1472_v36 = vmul.f32 %v1735_v42, %v1471_v0 }
0x12eb   :  { %875 = vrot.lane.b32.xlu0 %v2110_v19, %s1826_s1  ;;  %v713_v19 = vld [vmem:[#allocation5 + $0xc0] sm:$0xff] }
0x12ec   :  { %735 = vmatpush.msra.mxu2 %v713_v19  ;;  %v1473_v7 = vadd.f32 %v1735_v42, %v1472_v36 }
0x12ee   :  { %736 = vmatpush.msra.mxu2 %v712_v6  ;;  %v1477_v50 = vsel %vm1476_vm13, %v1735_v42, %v1473_v7 }
0x12ef   :  { %v1482_v54 = vsel %vm1479_vm14, %v1481_v9, %v1477_v50 }
0x12f0   :  { %v1485_v62 = vmul.f32 %v1482_v54, %v2186_v12  ;;  %v1345_v12 = vld [vmem:[#allocation5 + $0x140] sm:$0xff] }
0x12f3   :  { %1349 = vrot.lane.b32.xlu0 %v1343_v22, %s1826_s1  ;;  %v1503_v22 = vld [vmem:[#allocation5 + $0x160] sm:$0xff] }
0x134d   :  { %v1488_v51 = vpop.permute.xlu0 %1487 }
0x134e   :  { %v1490_v14 = vmul.f32 %v1488_v51, %v1482_v54 }
0x1350   :  { %1492 = vrot.lane.b32.xlu1 %v1490_v14, %s1826_s1 }
0x1355   :  { %v560_v55 = vpop.permute.xlu0 %559 }
0x1356   :  { %1568 = vmatmul.msk.f32.vlgmr.msrb.gmra.mxu2 %vm267_vm6, %v560_v55 }
0x1357   :  { %891 = vmatpush.msrb.mxu2 %v873_v3 }
0x1359   :  { %892 = vmatpush.msrb.mxu2 %v872_v56 }
0x135b   :  { %893 = vmatpush.msrb.mxu2 %v871_v59 }
0x135d   :  { %894 = vmatpush.msrb.mxu2 %v870_v13  ;;  %v876_v40 = vpop.permute.xlu0 %875 }
0x135e   :  { %1573 = vmatmul.msk.f32.vlgmr.msra.gmra.mxu2 %vm267_vm6, %v718_v39 }
0x135f   :  { %1049 = vmatpush.msra.mxu2 %v1031_v46 }
0x1361   :  { %1050 = vmatpush.msra.mxu2 %v1030_v47 }
0x1363   :  { %1051 = vmatpush.msra.mxu2 %v1029_v48 }
0x1365   :  { %1052 = vmatpush.msra.mxu2 %v1028_v49  ;;  %v1350_v26 = vpop.permute.xlu0 %1349 }
0x1366   :  { %1578 = vmatmul.msk.f32.vlgmr.msrb.gmra.mxu2 %vm267_vm6, %v876_v40 }
0x1367   :  { %1207 = vmatpush.msrb.mxu2 %v1189_v52 }
0x1369   :  { %1208 = vmatpush.msrb.mxu2 %v1188_v53 }
0x136b   :  { %1209 = vmatpush.msrb.mxu2 %v1187_v57 }
0x136d   :  { %1210 = vmatpush.msrb.mxu2 %v1186_v60 }
0x13c2   :  { %v1493_v41 = vpop.permute.xlu1 %1492 }
0x13c3   :  { %v1495_v43 = vadd.f32 %v1493_v41, %v1485_v62 }
0x13c5   :  { %1736 = vtanh.f32 %v1495_v43 }
0x13cb   :  { %v1737_v44 = vpop.eup %1736 }
0x13cc   :  { %1498 = vrot.lane.b32.xlu1 %v1737_v44, %s1825_s0 }
0x13d4   :  { %1033 = vrot.lane.b32.xlu1 %v2138_v58, %s1826_s1  ;;  %v1347_v58 = vld [vmem:[#allocation5 + $0x150] sm:$0xff] }
0x13d9   :  { %v580_v23 = vpop.f32.mrf.mxu2 }
0x13da   :  { %v583_v24 = vadd.f32 %v580_v23, %v425_v30 }
0x13e1   :  { %v738_v15 = vpop.f32.mrf.mxu2 }
0x13e2   :  { %v741_v31 = vadd.f32 %v738_v15, %v583_v24 }
0x13e9   :  { %v896_v29 = vpop.f32.mrf.mxu2 }
0x13ea   :  { %v899_v32 = vadd.f32 %v896_v29, %v741_v31 }
0x143e   :  { %v1499_v61 = vpop.permute.xlu1 %1498 }
0x143f   :  { %v1501_v63 = vmul.f32 %v1499_v61, %v1482_v54 }
0x1441   :  { %1507 = vrot.lane.b32.xlu1 %v1501_v63, %s1826_s1 }
0x1446   :  { %v1034_v5 = vpop.permute.xlu1 %1033 }
0x1447   :  { %1583 = vmatmul.msk.f32.vlgmr.msra.gmra.mxu2 %vm267_vm6, %v1034_v5 }
0x1448   :  { %1365 = vmatpush.msra.mxu2 %v1347_v58 }
0x144a   :  { %1366 = vmatpush.msra.mxu2 %v1346_v8 }
0x144c   :  { %1367 = vmatpush.msra.mxu2 %v1345_v12 }
0x144e   :  { %1368 = vmatpush.msra.mxu2 %v1344_v37 }
0x144f   :  { %1588 = vmatmul.msk.f32.vlgmr.msrb.gmra.mxu2 %vm267_vm6, %v1192_v1 }
0x1450   :  { %1523 = vmatpush.msrb.mxu2 %v1505_v17 }
0x1452   :  { %1524 = vmatpush.msrb.mxu2 %v1504_v20 }
0x1454   :  { %1525 = vmatpush.msrb.mxu2 %v1503_v22 }
0x1456   :  { %1526 = vmatpush.msrb.mxu2 %v1502_v16 }
0x1457   :  { %1593 = vmatmul.msk.f32.vlgmr.msra.gmra.mxu2 %vm267_vm6, %v1350_v26 }
0x14b3   :  { %v1508_v4 = vpop.permute.xlu1 %1507 }
0x14b4   :  { %1598 = vmatmul.msk.f32.vlgmr.msrb.gmra.mxu2 %vm267_vm6, %v1508_v4  ;;  %vm1532_vm6 = vcmask 58368  }
0x14ca   :  { %v1054_v18 = vpop.f32.mrf.mxu2 }
0x14cb   :  { %v1057_v33 = vadd.f32 %v1054_v18, %v899_v32 }
0x14d2   :  { %v1212_v21 = vpop.f32.mrf.mxu2 }
0x14d3   :  { %v1215_v34 = vadd.f32 %v1212_v21, %v1057_v33 }
0x14da   :  { %v1370_v27 = vpop.f32.mrf.mxu2 }
0x14db   :  { %v1373_v35 = vadd.f32 %v1370_v27, %v1215_v34 }
0x1537   :  { %v1528_v38 = vpop.f32.mrf.mxu2 }
0x1538   :  { %v1531_v25 = vadd.f32 %v1528_v38, %v1373_v35 }
0x153a   :  { %1533 = vst.msk [vmem:[#allocation7] sm:$0x3] %vm1532_vm6, %v1531_v25 }
0x153b   :  { %1544 = dma.vmem_to_hbm [thread:$0]  %s1540_s22, 32, %s1542_s25, [#allocation4]  }
0x153c   :  { %1818 = dma.done.wait [#allocation4], 32  }
0x153d   :  { %1819 = vsyncadd [#allocation4], 4294967264 }
0x153e   :  { %1549 = vsyncpa [#allocation3], 1 }
0x153f   :  { %1550 = vsyncpa [#allocation6], 1 }
0x1540   :  { %1551 = vsyncpa [#allocation4], 1 }

</bundles_post_ra>
